<compile_context>
chip_gen: v5e
topology: v5e:2x2
jax: 0.10.0
libtpu: 0.0.40
codegen_flags: <defaults>
</compile_context>

<pallas_src>
import numpy as np

import jax
import jax.numpy as jnp
from jax.experimental import pallas as pl
from jax.experimental.pallas import tpu as pltpu


# ----------------------------------------------------------------------------
# Model configuration
# ----------------------------------------------------------------------------
B = 2             # batch
F0 = 16           # input_dim (freq bins)
T0 = 16           # nb_steps (time)
LANES = 64        # lane width of all activation slabs (max used lane = 63)

T_E0, T_E1, T_D0, T_RO = 8, 4, 8, 16   # per-layer output time steps

# TODO(synk): exact LIF/LI neuron parameters and spike_fn are not given with the
#             module; standard hard-reset LIF (alpha=0.9, v_th=1.0) and leaky
#             integrator (beta=0.9) are used, same as the previous version.
ALPHA = 0.9
V_TH = 1.0
BETA = 0.9


# ----------------------------------------------------------------------------
# Fused UNetSNN forward kernel (values only; no scratch, no grid)
# ----------------------------------------------------------------------------
def _unet_snn_kernel(x_ref, w0_ref, l0_ref, w1_ref, l1_ref, w2_ref, l2_ref,
                     w3_ref, l3_ref, b_ref, li_ref, out_ref):

    def conv(x_bf16, l_ref, w_ref, layer_idx, t_out):
        """acc = sum_j (L_j @ X) @ W_j + bias.

        x_bf16: (t_in*B, LANES) bf16, rows=(t,b), lanes=(cin,fin)
        l_ref : (3*t_out*B, t_in*B) bf16  -- time taps / stride / upsample / pad
        w_ref : (3, LANES, LANES) bf16    -- freq taps / stride / upsample / pad
        """
        m = t_out * B
        taps = jnp.dot(l_ref[...], x_bf16, preferred_element_type=jnp.float32)
        acc = jnp.dot(taps[0:m].astype(jnp.bfloat16), w_ref[0],
                      preferred_element_type=jnp.float32)
        acc = acc + jnp.dot(taps[m:2 * m].astype(jnp.bfloat16), w_ref[1],
                            preferred_element_type=jnp.float32)
        acc = acc + jnp.dot(taps[2 * m:3 * m].astype(jnp.bfloat16), w_ref[2],
                            preferred_element_type=jnp.float32)
        return acc + b_ref[layer_idx:layer_idx + 1, :]

    def lif(acc, t_out):
        """Hard-reset LIF over time (unrolled). acc: (t_out*B, LANES) f32."""
        mem = jnp.zeros((B, LANES), jnp.float32)
        spk = jnp.zeros((B, LANES), jnp.float32)
        blocks = []
        for t in range(t_out):
            mem = ALPHA * mem * (1.0 - spk) + acc[t * B:(t + 1) * B, :]
            spk = (mem >= V_TH).astype(jnp.float32)
            blocks.append(spk)
        return jnp.concatenate(blocks, axis=0)

    x = x_ref[...]                                         # (T0*B, 64) bf16

    # encoder 0: Conv(1->4, s2) + LIF   -> spikes at lanes 32..63
    acc0 = conv(x, l0_ref, w0_ref, 0, T_E0)
    s0 = lif(acc0, T_E0)                                   # (16, 64)

    # encoder 1: Conv(4->8, s2) + LIF   -> spikes at lanes 0..31
    acc1 = conv(s0.astype(jnp.bfloat16), l1_ref, w1_ref, 1, T_E1)
    s1 = lif(acc1, T_E1)                                   # (8, 64)

    # decoder 0: upsample x2 (folded into L/W) -> Conv(8->4, s1) + LIF
    acc2 = conv(s1.astype(jnp.bfloat16), l2_ref, w2_ref, 2, T_D0)
    s2 = lif(acc2, T_D0)                                   # (16, 64), lanes 0..31

    # readout: cat(dec0, enc0 skip) = add of disjoint lane groups,
    #          upsample x2 (folded) -> Conv(8->1, s1) -> leaky integrator
    cat = (s2 + s0).astype(jnp.bfloat16)                   # lanes 0..31 | 32..63
    acc3 = conv(cat, l3_ref, w3_ref, 3, T_RO)              # (32, 64) f32

    # LI membrane trajectory as one lower-triangular beta-power GEMM,
    # written with a single lane-dense store.
    out_ref[...] = jnp.dot(li_ref[...], acc3, preferred_element_type=jnp.float32)


# ----------------------------------------------------------------------------
# Host-side parameter preparation (done once, outside the hot path)
# ----------------------------------------------------------------------------
def _up2_matrix(n):
    """(2n, n) 2x bilinear upsample (half-pixel centers, edge clamp) ==
    nn.Upsample(scale_factor=2, mode='bilinear', align_corners=False)."""
    u = np.zeros((2 * n, n), np.float32)
    for k in range(n):
        u[2 * k, k] += 0.75
        u[2 * k, max(k - 1, 0)] += 0.25
        u[2 * k + 1, k] += 0.75
        u[2 * k + 1, min(k + 1, n - 1)] += 0.25
    return u


def _time_left_matrix(t_in, t_out, stride, upsample):
    """Stacked (3*t_out*B, t_in*B) matrix: per time tap j, rows select/blend the
    (optionally 2x-upsampled) input time block t*stride-1+j (zero row = time pad)."""
    uf = 2 if upsample else 1
    up = _up2_matrix(t_in) if upsample else np.eye(t_in, dtype=np.float32)
    eye_b = np.eye(B, dtype=np.float32)
    mats = []
    for j in range(3):
        a = np.zeros((t_out, t_in), np.float32)
        for t in range(t_out):
            u = t * stride - 1 + j
            if 0 <= u < t_in * uf:
                a[t] = up[u]
        mats.append(np.kron(a, eye_b))
    return np.concatenate(mats, axis=0)


def _freq_conv_matrix(kvec, f_out, f_in, stride, upsample):
    """(f_out, f_in) matrix: 1-D freq conv (k=3, pad=1, stride) composed with an
    optional 2x bilinear freq upsample of the stored activation."""
    uf = 2 if upsample else 1
    up = _up2_matrix(f_in) if upsample else np.eye(f_in, dtype=np.float32)
    c = np.zeros((f_out, f_in * uf), np.float32)
    for fo in range(f_out):
        for i in range(3):
            fi = fo * stride - 1 + i
            if 0 <= fi < f_in * uf:
                c[fo, fi] += kvec[i]
    return c @ up


def _build_layer(w, b, in_lanes, out_lanes, stride, upsample, t_in, t_out):
    """PyTorch conv weight (Cout, Cin, kH=freq, kW=time) + bias -> kernel tensors."""
    w = np.asarray(w, np.float32)
    b = np.asarray(b, np.float32)
    cout, cin = w.shape[0], w.shape[1]
    f_in = in_lanes.shape[1]
    f_out = out_lanes.shape[1]
    wmat = np.zeros((3, LANES, LANES), np.float32)
    for j in range(3):                      # time tap
        for co in range(cout):
            for ci in range(cin):
                a = _freq_conv_matrix(w[co, ci, :, j], f_out, f_in, stride, upsample)
                wmat[j][np.ix_(in_lanes[ci], out_lanes[co])] += a.T
    lmat = _time_left_matrix(t_in, t_out, stride, upsample)
    bias = np.zeros((LANES,), np.float32)
    for co in range(cout):
        bias[out_lanes[co]] = b[co]
    return jnp.asarray(wmat, jnp.bfloat16), jnp.asarray(lmat, jnp.bfloat16), bias


# Lane maps: lane = position of (channel, freq) in the 64-lane activation slabs.
_LANES_X = np.arange(F0)[None, :]                                       # input
_LANES_E0 = 32 + (np.arange(4)[:, None] * 8 + np.arange(8)[None, :])    # enc0 out
_LANES_E1 = np.arange(8)[:, None] * 4 + np.arange(4)[None, :]           # enc1 out
_LANES_D0 = np.arange(4)[:, None] * 8 + np.arange(8)[None, :]           # dec0 out
_LANES_RO_IN = np.concatenate([_LANES_D0, _LANES_E0], axis=0)           # cat order: (dec0, enc0)
_LANES_RO_OUT = np.arange(F0)[None, :]                                  # readout out


def prepare_params(params):
    w0, l0, b0 = _build_layer(*params["enc0"], _LANES_X, _LANES_E0, 2, False, T0, T_E0)
    w1, l1, b1 = _build_layer(*params["enc1"], _LANES_E0, _LANES_E1, 2, False, T_E0, T_E1)
    w2, l2, b2 = _build_layer(*params["dec0"], _LANES_E1, _LANES_D0, 1, True, T_E1, T_D0)
    w3, l3, b3 = _build_layer(*params["readout"], _LANES_RO_IN, _LANES_RO_OUT, 1, True, T_D0, T_RO)
    biases = jnp.asarray(np.stack([b0, b1, b2, b3]), jnp.float32)        # (4, 64)

    # leaky-integrator readout as a lower-triangular beta-power matrix
    tri = np.zeros((T0, T0), np.float32)
    for t in range(T0):
        for tau in range(t + 1):
            tri[t, tau] = BETA ** (t - tau)
    li = jnp.asarray(np.kron(tri, np.eye(B, dtype=np.float32)), jnp.float32)  # (32, 32)

    return dict(w0=w0, l0=l0, w1=w1, l1=l1, w2=w2, l2=l2, w3=w3, l3=l3,
                biases=biases, li=li)


# ----------------------------------------------------------------------------
# Forward wrapper: tiny pack, one pallas_call, tiny unpack
# ----------------------------------------------------------------------------
@jax.jit
def unet_snn_forward(prepped, x):
    # pack (B,1,F,T) f32 -> rows=(t,b), lanes=freq, bf16 (spikes are 0/1: exact)
    xk = jnp.transpose(x[:, 0], (2, 0, 1)).reshape(T0 * B, F0)
    xk = jnp.pad(xk, ((0, 0), (0, LANES - F0))).astype(jnp.bfloat16)

    out = pl.pallas_call(
        _unet_snn_kernel,
        out_shape=jax.ShapeDtypeStruct((T0 * B, LANES), jnp.float32),
        in_specs=[pl.BlockSpec(memory_space=pltpu.MemorySpace.VMEM)] * 11,
        out_specs=pl.BlockSpec(memory_space=pltpu.MemorySpace.VMEM),
    )(xk, prepped["w0"], prepped["l0"], prepped["w1"], prepped["l1"],
      prepped["w2"], prepped["l2"], prepped["w3"], prepped["l3"],
      prepped["biases"], prepped["li"])

    # unpack (T*B, 64) -> (B, 1, F, T); only lanes 0..15 are real
    mem = out[:, :F0].reshape(T0, B, F0).transpose(1, 2, 0)[:, None, :, :]
    return mem, []      # use_intermediate_output=False -> no intermediate outputs


# ----------------------------------------------------------------------------
# Deterministic parameter init (shapes implied by the chosen UNetSNN config)
# ----------------------------------------------------------------------------
def init_params(key):
    def conv_init(k, cout, cin, kh, kw):
        k1, k2 = jax.random.split(k)
        fan_in = cin * kh * kw
        w = jax.random.normal(k1, (cout, cin, kh, kw), jnp.float32) / jnp.sqrt(fan_in)
        b = 0.01 * jax.random.normal(k2, (cout,), jnp.float32)
        return w, b

    k0, k1, k2, k3 = jax.random.split(key, 4)
    return {
        "enc0": conv_init(k0, 4, 1, 3, 3),
        "enc1": conv_init(k1, 8, 4, 3, 3),
        "dec0": conv_init(k2, 4, 8, 3, 3),
        "readout": conv_init(k3, 1, 8, 3, 3),
    }


if __name__ == "__main__":
    key = jax.random.PRNGKey(0)
    kp, kx = jax.random.split(key)
    params = init_params(kp)
    prepped = prepare_params(params)

    # input spikes: (batch=2, channels=1, input_dim=16 freq bins, nb_steps=16)
    x = (jax.random.uniform(kx, (B, 1, F0, T0)) < 0.3).astype(jnp.float32)

    mem, output = unet_snn_forward(prepped, x)
    jax.block_until_ready(mem)

    assert mem.shape == (B, 1, F0, T0), mem.shape
    assert mem.dtype == jnp.float32
    assert isinstance(output, list) and len(output) == 0
    print("KERNEL_OK")
</pallas_src>

<mosaic_0001>
module attributes {stable_mosaic.version = 11 : i64} {
  func.func @_unet_snn_kernel(%arg0: memref<32x64xbf16, #tpu.memory_space<vmem>>, %arg1: memref<3x64x64xbf16, #tpu.memory_space<vmem>>, %arg2: memref<48x32xbf16, #tpu.memory_space<vmem>>, %arg3: memref<3x64x64xbf16, #tpu.memory_space<vmem>>, %arg4: memref<24x16xbf16, #tpu.memory_space<vmem>>, %arg5: memref<3x64x64xbf16, #tpu.memory_space<vmem>>, %arg6: memref<48x8xbf16, #tpu.memory_space<vmem>>, %arg7: memref<3x64x64xbf16, #tpu.memory_space<vmem>>, %arg8: memref<96x16xbf16, #tpu.memory_space<vmem>>, %arg9: memref<4x64xf32, #tpu.memory_space<vmem>>, %arg10: memref<32x32xf32, #tpu.memory_space<vmem>>, %arg11: memref<32x64xf32, #tpu.memory_space<vmem>>) attributes {dimension_semantics = [], scalar_prefetch = 0 : i64, scratch_operands = 0 : i64, tpu.core_type = #tpu.core_type<tc>} {
    %c0 = arith.constant 0 : index
    %c0_0 = arith.constant 0 : index
    %0 = vector.load %arg0[%c0, %c0_0] : memref<32x64xbf16, #tpu.memory_space<vmem>>, vector<32x64xbf16>
    %c0_1 = arith.constant 0 : index
    %c0_2 = arith.constant 0 : index
    %1 = vector.load %arg2[%c0_1, %c0_2] : memref<48x32xbf16, #tpu.memory_space<vmem>>, vector<48x32xbf16>
    %cst = arith.constant dense<0.000000e+00> : vector<48x64xf32>
    %2 = tpu.matmul %1, %0, %cst {dimension_numbers = #tpu.dot_dimension_numbers<[1], [0], [0], [1], [0, 0, 1, 1], [], []>} : vector<48x32xbf16>, vector<32x64xbf16>, vector<48x64xf32> -> vector<48x64xf32>
    %3 = vector.extract_strided_slice %2 {offsets = [0, 0], sizes = [16, 64], strides = [1, 1]} : vector<48x64xf32> to vector<16x64xf32>
    %4 = arith.truncf %3 : vector<16x64xf32> to vector<16x64xbf16>
    %c0_3 = arith.constant 0 : index
    %c0_4 = arith.constant 0 : index
    %c0_5 = arith.constant 0 : index
    %5 = vector.load %arg1[%c0_3, %c0_4, %c0_5] : memref<3x64x64xbf16, #tpu.memory_space<vmem>>, vector<1x64x64xbf16>
    %6 = vector.shape_cast %5 : vector<1x64x64xbf16> to vector<64x64xbf16>
    %cst_6 = arith.constant dense<0.000000e+00> : vector<16x64xf32>
    %7 = tpu.matmul %4, %6, %cst_6 {dimension_numbers = #tpu.dot_dimension_numbers<[1], [0], [0], [1], [0, 0, 1, 1], [], []>} : vector<16x64xbf16>, vector<64x64xbf16>, vector<16x64xf32> -> vector<16x64xf32>
    %8 = vector.extract_strided_slice %2 {offsets = [16, 0], sizes = [16, 64], strides = [1, 1]} : vector<48x64xf32> to vector<16x64xf32>
    %9 = arith.truncf %8 : vector<16x64xf32> to vector<16x64xbf16>
    %c1 = arith.constant 1 : index
    %c0_7 = arith.constant 0 : index
    %c0_8 = arith.constant 0 : index
    %10 = vector.load %arg1[%c1, %c0_7, %c0_8] : memref<3x64x64xbf16, #tpu.memory_space<vmem>>, vector<1x64x64xbf16>
    %11 = vector.shape_cast %10 : vector<1x64x64xbf16> to vector<64x64xbf16>
    %cst_9 = arith.constant dense<0.000000e+00> : vector<16x64xf32>
    %12 = tpu.matmul %9, %11, %cst_9 {dimension_numbers = #tpu.dot_dimension_numbers<[1], [0], [0], [1], [0, 0, 1, 1], [], []>} : vector<16x64xbf16>, vector<64x64xbf16>, vector<16x64xf32> -> vector<16x64xf32>
    %13 = arith.addf %7, %12 : vector<16x64xf32>
    %14 = vector.extract_strided_slice %2 {offsets = [32, 0], sizes = [16, 64], strides = [1, 1]} : vector<48x64xf32> to vector<16x64xf32>
    %15 = arith.truncf %14 : vector<16x64xf32> to vector<16x64xbf16>
    %c2 = arith.constant 2 : index
    %c0_10 = arith.constant 0 : index
    %c0_11 = arith.constant 0 : index
    %16 = vector.load %arg1[%c2, %c0_10, %c0_11] : memref<3x64x64xbf16, #tpu.memory_space<vmem>>, vector<1x64x64xbf16>
    %17 = vector.shape_cast %16 : vector<1x64x64xbf16> to vector<64x64xbf16>
    %cst_12 = arith.constant dense<0.000000e+00> : vector<16x64xf32>
    %18 = tpu.matmul %15, %17, %cst_12 {dimension_numbers = #tpu.dot_dimension_numbers<[1], [0], [0], [1], [0, 0, 1, 1], [], []>} : vector<16x64xbf16>, vector<64x64xbf16>, vector<16x64xf32> -> vector<16x64xf32>
    %19 = arith.addf %13, %18 : vector<16x64xf32>
    %c0_13 = arith.constant 0 : index
    %c0_14 = arith.constant 0 : index
    %20 = vector.load %arg9[%c0_13, %c0_14] : memref<4x64xf32, #tpu.memory_space<vmem>>, vector<1x64xf32>
    %21 = vector.broadcast %20 : vector<1x64xf32> to vector<16x64xf32>
    %22 = arith.addf %19, %21 : vector<16x64xf32>
    %cst_15 = arith.constant 0.000000e+00 : f32
    %23 = vector.broadcast %cst_15 : f32 to vector<2x64xf32>
    %cst_16 = arith.constant 0.000000e+00 : f32
    %24 = vector.broadcast %cst_16 : f32 to vector<2x64xf32>
    %cst_17 = arith.constant 0.899999976 : f32
    %25 = vector.broadcast %cst_17 : f32 to vector<2x64xf32>
    %26 = arith.mulf %25, %23 : vector<2x64xf32>
    %cst_18 = arith.constant 1.000000e+00 : f32
    %27 = vector.broadcast %cst_18 : f32 to vector<2x64xf32>
    %28 = arith.subf %27, %24 : vector<2x64xf32>
    %29 = arith.mulf %26, %28 : vector<2x64xf32>
    %30 = vector.extract_strided_slice %22 {offsets = [0, 0], sizes = [2, 64], strides = [1, 1]} : vector<16x64xf32> to vector<2x64xf32>
    %31 = arith.addf %29, %30 : vector<2x64xf32>
    %cst_19 = arith.constant 1.000000e+00 : f32
    %32 = vector.broadcast %cst_19 : f32 to vector<2x64xf32>
    %33 = arith.cmpf oge, %31, %32 : vector<2x64xf32>
    %34 = arith.extui %33 : vector<2x64xi1> to vector<2x64xi32>
    %35 = arith.sitofp %34 : vector<2x64xi32> to vector<2x64xf32>
    %cst_20 = arith.constant 0.899999976 : f32
    %36 = vector.broadcast %cst_20 : f32 to vector<2x64xf32>
    %37 = arith.mulf %36, %31 : vector<2x64xf32>
    %cst_21 = arith.constant 1.000000e+00 : f32
    %38 = vector.broadcast %cst_21 : f32 to vector<2x64xf32>
    %39 = arith.subf %38, %35 : vector<2x64xf32>
    %40 = arith.mulf %37, %39 : vector<2x64xf32>
    %41 = vector.extract_strided_slice %22 {offsets = [2, 0], sizes = [2, 64], strides = [1, 1]} : vector<16x64xf32> to vector<2x64xf32>
    %42 = arith.addf %40, %41 : vector<2x64xf32>
    %cst_22 = arith.constant 1.000000e+00 : f32
    %43 = vector.broadcast %cst_22 : f32 to vector<2x64xf32>
    %44 = arith.cmpf oge, %42, %43 : vector<2x64xf32>
    %45 = arith.extui %44 : vector<2x64xi1> to vector<2x64xi32>
    %46 = arith.sitofp %45 : vector<2x64xi32> to vector<2x64xf32>
    %cst_23 = arith.constant 0.899999976 : f32
    %47 = vector.broadcast %cst_23 : f32 to vector<2x64xf32>
    %48 = arith.mulf %47, %42 : vector<2x64xf32>
    %cst_24 = arith.constant 1.000000e+00 : f32
    %49 = vector.broadcast %cst_24 : f32 to vector<2x64xf32>
    %50 = arith.subf %49, %46 : vector<2x64xf32>
    %51 = arith.mulf %48, %50 : vector<2x64xf32>
    %52 = vector.extract_strided_slice %22 {offsets = [4, 0], sizes = [2, 64], strides = [1, 1]} : vector<16x64xf32> to vector<2x64xf32>
    %53 = arith.addf %51, %52 : vector<2x64xf32>
    %cst_25 = arith.constant 1.000000e+00 : f32
    %54 = vector.broadcast %cst_25 : f32 to vector<2x64xf32>
    %55 = arith.cmpf oge, %53, %54 : vector<2x64xf32>
    %56 = arith.extui %55 : vector<2x64xi1> to vector<2x64xi32>
    %57 = arith.sitofp %56 : vector<2x64xi32> to vector<2x64xf32>
    %cst_26 = arith.constant 0.899999976 : f32
    %58 = vector.broadcast %cst_26 : f32 to vector<2x64xf32>
    %59 = arith.mulf %58, %53 : vector<2x64xf32>
    %cst_27 = arith.constant 1.000000e+00 : f32
    %60 = vector.broadcast %cst_27 : f32 to vector<2x64xf32>
    %61 = arith.subf %60, %57 : vector<2x64xf32>
    %62 = arith.mulf %59, %61 : vector<2x64xf32>
    %63 = vector.extract_strided_slice %22 {offsets = [6, 0], sizes = [2, 64], strides = [1, 1]} : vector<16x64xf32> to vector<2x64xf32>
    %64 = arith.addf %62, %63 : vector<2x64xf32>
    %cst_28 = arith.constant 1.000000e+00 : f32
    %65 = vector.broadcast %cst_28 : f32 to vector<2x64xf32>
    %66 = arith.cmpf oge, %64, %65 : vector<2x64xf32>
    %67 = arith.extui %66 : vector<2x64xi1> to vector<2x64xi32>
    %68 = arith.sitofp %67 : vector<2x64xi32> to vector<2x64xf32>
    %cst_29 = arith.constant 0.899999976 : f32
    %69 = vector.broadcast %cst_29 : f32 to vector<2x64xf32>
    %70 = arith.mulf %69, %64 : vector<2x64xf32>
    %cst_30 = arith.constant 1.000000e+00 : f32
    %71 = vector.broadcast %cst_30 : f32 to vector<2x64xf32>
    %72 = arith.subf %71, %68 : vector<2x64xf32>
    %73 = arith.mulf %70, %72 : vector<2x64xf32>
    %74 = vector.extract_strided_slice %22 {offsets = [8, 0], sizes = [2, 64], strides = [1, 1]} : vector<16x64xf32> to vector<2x64xf32>
    %75 = arith.addf %73, %74 : vector<2x64xf32>
    %cst_31 = arith.constant 1.000000e+00 : f32
    %76 = vector.broadcast %cst_31 : f32 to vector<2x64xf32>
    %77 = arith.cmpf oge, %75, %76 : vector<2x64xf32>
    %78 = arith.extui %77 : vector<2x64xi1> to vector<2x64xi32>
    %79 = arith.sitofp %78 : vector<2x64xi32> to vector<2x64xf32>
    %cst_32 = arith.constant 0.899999976 : f32
    %80 = vector.broadcast %cst_32 : f32 to vector<2x64xf32>
    %81 = arith.mulf %80, %75 : vector<2x64xf32>
    %cst_33 = arith.constant 1.000000e+00 : f32
    %82 = vector.broadcast %cst_33 : f32 to vector<2x64xf32>
    %83 = arith.subf %82, %79 : vector<2x64xf32>
    %84 = arith.mulf %81, %83 : vector<2x64xf32>
    %85 = vector.extract_strided_slice %22 {offsets = [10, 0], sizes = [2, 64], strides = [1, 1]} : vector<16x64xf32> to vector<2x64xf32>
    %86 = arith.addf %84, %85 : vector<2x64xf32>
    %cst_34 = arith.constant 1.000000e+00 : f32
    %87 = vector.broadcast %cst_34 : f32 to vector<2x64xf32>
    %88 = arith.cmpf oge, %86, %87 : vector<2x64xf32>
    %89 = arith.extui %88 : vector<2x64xi1> to vector<2x64xi32>
    %90 = arith.sitofp %89 : vector<2x64xi32> to vector<2x64xf32>
    %cst_35 = arith.constant 0.899999976 : f32
    %91 = vector.broadcast %cst_35 : f32 to vector<2x64xf32>
    %92 = arith.mulf %91, %86 : vector<2x64xf32>
    %cst_36 = arith.constant 1.000000e+00 : f32
    %93 = vector.broadcast %cst_36 : f32 to vector<2x64xf32>
    %94 = arith.subf %93, %90 : vector<2x64xf32>
    %95 = arith.mulf %92, %94 : vector<2x64xf32>
    %96 = vector.extract_strided_slice %22 {offsets = [12, 0], sizes = [2, 64], strides = [1, 1]} : vector<16x64xf32> to vector<2x64xf32>
    %97 = arith.addf %95, %96 : vector<2x64xf32>
    %cst_37 = arith.constant 1.000000e+00 : f32
    %98 = vector.broadcast %cst_37 : f32 to vector<2x64xf32>
    %99 = arith.cmpf oge, %97, %98 : vector<2x64xf32>
    %100 = arith.extui %99 : vector<2x64xi1> to vector<2x64xi32>
    %101 = arith.sitofp %100 : vector<2x64xi32> to vector<2x64xf32>
    %cst_38 = arith.constant 0.899999976 : f32
    %102 = vector.broadcast %cst_38 : f32 to vector<2x64xf32>
    %103 = arith.mulf %102, %97 : vector<2x64xf32>
    %cst_39 = arith.constant 1.000000e+00 : f32
    %104 = vector.broadcast %cst_39 : f32 to vector<2x64xf32>
    %105 = arith.subf %104, %101 : vector<2x64xf32>
    %106 = arith.mulf %103, %105 : vector<2x64xf32>
    %107 = vector.extract_strided_slice %22 {offsets = [14, 0], sizes = [2, 64], strides = [1, 1]} : vector<16x64xf32> to vector<2x64xf32>
    %108 = arith.addf %106, %107 : vector<2x64xf32>
    %cst_40 = arith.constant 1.000000e+00 : f32
    %109 = vector.broadcast %cst_40 : f32 to vector<2x64xf32>
    %110 = arith.cmpf oge, %108, %109 : vector<2x64xf32>
    %111 = arith.extui %110 : vector<2x64xi1> to vector<2x64xi32>
    %112 = arith.sitofp %111 : vector<2x64xi32> to vector<2x64xf32>
    %113 = tpu.concatenate %35, %46, %57, %68, %79, %90, %101, %112 in 0 : vector<2x64xf32>, vector<2x64xf32>, vector<2x64xf32>, vector<2x64xf32>, vector<2x64xf32>, vector<2x64xf32>, vector<2x64xf32>, vector<2x64xf32> -> vector<16x64xf32>
    %114 = arith.truncf %113 : vector<16x64xf32> to vector<16x64xbf16>
    %c0_41 = arith.constant 0 : index
    %c0_42 = arith.constant 0 : index
    %115 = vector.load %arg4[%c0_41, %c0_42] : memref<24x16xbf16, #tpu.memory_space<vmem>>, vector<24x16xbf16>
    %cst_43 = arith.constant dense<0.000000e+00> : vector<24x64xf32>
    %116 = tpu.matmul %115, %114, %cst_43 {dimension_numbers = #tpu.dot_dimension_numbers<[1], [0], [0], [1], [0, 0, 1, 1], [], []>} : vector<24x16xbf16>, vector<16x64xbf16>, vector<24x64xf32> -> vector<24x64xf32>
    %117 = vector.extract_strided_slice %116 {offsets = [0, 0], sizes = [8, 64], strides = [1, 1]} : vector<24x64xf32> to vector<8x64xf32>
    %118 = arith.truncf %117 : vector<8x64xf32> to vector<8x64xbf16>
    %c0_44 = arith.constant 0 : index
    %c0_45 = arith.constant 0 : index
    %c0_46 = arith.constant 0 : index
    %119 = vector.load %arg3[%c0_44, %c0_45, %c0_46] : memref<3x64x64xbf16, #tpu.memory_space<vmem>>, vector<1x64x64xbf16>
    %120 = vector.shape_cast %119 : vector<1x64x64xbf16> to vector<64x64xbf16>
    %cst_47 = arith.constant dense<0.000000e+00> : vector<8x64xf32>
    %121 = tpu.matmul %118, %120, %cst_47 {dimension_numbers = #tpu.dot_dimension_numbers<[1], [0], [0], [1], [0, 0, 1, 1], [], []>} : vector<8x64xbf16>, vector<64x64xbf16>, vector<8x64xf32> -> vector<8x64xf32>
    %122 = vector.extract_strided_slice %116 {offsets = [8, 0], sizes = [8, 64], strides = [1, 1]} : vector<24x64xf32> to vector<8x64xf32>
    %123 = arith.truncf %122 : vector<8x64xf32> to vector<8x64xbf16>
    %c1_48 = arith.constant 1 : index
    %c0_49 = arith.constant 0 : index
    %c0_50 = arith.constant 0 : index
    %124 = vector.load %arg3[%c1_48, %c0_49, %c0_50] : memref<3x64x64xbf16, #tpu.memory_space<vmem>>, vector<1x64x64xbf16>
    %125 = vector.shape_cast %124 : vector<1x64x64xbf16> to vector<64x64xbf16>
    %cst_51 = arith.constant dense<0.000000e+00> : vector<8x64xf32>
    %126 = tpu.matmul %123, %125, %cst_51 {dimension_numbers = #tpu.dot_dimension_numbers<[1], [0], [0], [1], [0, 0, 1, 1], [], []>} : vector<8x64xbf16>, vector<64x64xbf16>, vector<8x64xf32> -> vector<8x64xf32>
    %127 = arith.addf %121, %126 : vector<8x64xf32>
    %128 = vector.extract_strided_slice %116 {offsets = [16, 0], sizes = [8, 64], strides = [1, 1]} : vector<24x64xf32> to vector<8x64xf32>
    %129 = arith.truncf %128 : vector<8x64xf32> to vector<8x64xbf16>
    %c2_52 = arith.constant 2 : index
    %c0_53 = arith.constant 0 : index
    %c0_54 = arith.constant 0 : index
    %130 = vector.load %arg3[%c2_52, %c0_53, %c0_54] : memref<3x64x64xbf16, #tpu.memory_space<vmem>>, vector<1x64x64xbf16>
    %131 = vector.shape_cast %130 : vector<1x64x64xbf16> to vector<64x64xbf16>
    %cst_55 = arith.constant dense<0.000000e+00> : vector<8x64xf32>
    %132 = tpu.matmul %129, %131, %cst_55 {dimension_numbers = #tpu.dot_dimension_numbers<[1], [0], [0], [1], [0, 0, 1, 1], [], []>} : vector<8x64xbf16>, vector<64x64xbf16>, vector<8x64xf32> -> vector<8x64xf32>
    %133 = arith.addf %127, %132 : vector<8x64xf32>
    %c1_56 = arith.constant 1 : index
    %c0_57 = arith.constant 0 : index
    %134 = vector.load %arg9[%c1_56, %c0_57] : memref<4x64xf32, #tpu.memory_space<vmem>>, vector<1x64xf32>
    %135 = vector.broadcast %134 : vector<1x64xf32> to vector<8x64xf32>
    %136 = arith.addf %133, %135 : vector<8x64xf32>
    %cst_58 = arith.constant 0.000000e+00 : f32
    %137 = vector.broadcast %cst_58 : f32 to vector<2x64xf32>
    %cst_59 = arith.constant 0.000000e+00 : f32
    %138 = vector.broadcast %cst_59 : f32 to vector<2x64xf32>
    %cst_60 = arith.constant 0.899999976 : f32
    %139 = vector.broadcast %cst_60 : f32 to vector<2x64xf32>
    %140 = arith.mulf %139, %137 : vector<2x64xf32>
    %cst_61 = arith.constant 1.000000e+00 : f32
    %141 = vector.broadcast %cst_61 : f32 to vector<2x64xf32>
    %142 = arith.subf %141, %138 : vector<2x64xf32>
    %143 = arith.mulf %140, %142 : vector<2x64xf32>
    %144 = vector.extract_strided_slice %136 {offsets = [0, 0], sizes = [2, 64], strides = [1, 1]} : vector<8x64xf32> to vector<2x64xf32>
    %145 = arith.addf %143, %144 : vector<2x64xf32>
    %cst_62 = arith.constant 1.000000e+00 : f32
    %146 = vector.broadcast %cst_62 : f32 to vector<2x64xf32>
    %147 = arith.cmpf oge, %145, %146 : vector<2x64xf32>
    %148 = arith.extui %147 : vector<2x64xi1> to vector<2x64xi32>
    %149 = arith.sitofp %148 : vector<2x64xi32> to vector<2x64xf32>
    %cst_63 = arith.constant 0.899999976 : f32
    %150 = vector.broadcast %cst_63 : f32 to vector<2x64xf32>
    %151 = arith.mulf %150, %145 : vector<2x64xf32>
    %cst_64 = arith.constant 1.000000e+00 : f32
    %152 = vector.broadcast %cst_64 : f32 to vector<2x64xf32>
    %153 = arith.subf %152, %149 : vector<2x64xf32>
    %154 = arith.mulf %151, %153 : vector<2x64xf32>
    %155 = vector.extract_strided_slice %136 {offsets = [2, 0], sizes = [2, 64], strides = [1, 1]} : vector<8x64xf32> to vector<2x64xf32>
    %156 = arith.addf %154, %155 : vector<2x64xf32>
    %cst_65 = arith.constant 1.000000e+00 : f32
    %157 = vector.broadcast %cst_65 : f32 to vector<2x64xf32>
    %158 = arith.cmpf oge, %156, %157 : vector<2x64xf32>
    %159 = arith.extui %158 : vector<2x64xi1> to vector<2x64xi32>
    %160 = arith.sitofp %159 : vector<2x64xi32> to vector<2x64xf32>
    %cst_66 = arith.constant 0.899999976 : f32
    %161 = vector.broadcast %cst_66 : f32 to vector<2x64xf32>
    %162 = arith.mulf %161, %156 : vector<2x64xf32>
    %cst_67 = arith.constant 1.000000e+00 : f32
    %163 = vector.broadcast %cst_67 : f32 to vector<2x64xf32>
    %164 = arith.subf %163, %160 : vector<2x64xf32>
    %165 = arith.mulf %162, %164 : vector<2x64xf32>
    %166 = vector.extract_strided_slice %136 {offsets = [4, 0], sizes = [2, 64], strides = [1, 1]} : vector<8x64xf32> to vector<2x64xf32>
    %167 = arith.addf %165, %166 : vector<2x64xf32>
    %cst_68 = arith.constant 1.000000e+00 : f32
    %168 = vector.broadcast %cst_68 : f32 to vector<2x64xf32>
    %169 = arith.cmpf oge, %167, %168 : vector<2x64xf32>
    %170 = arith.extui %169 : vector<2x64xi1> to vector<2x64xi32>
    %171 = arith.sitofp %170 : vector<2x64xi32> to vector<2x64xf32>
    %cst_69 = arith.constant 0.899999976 : f32
    %172 = vector.broadcast %cst_69 : f32 to vector<2x64xf32>
    %173 = arith.mulf %172, %167 : vector<2x64xf32>
    %cst_70 = arith.constant 1.000000e+00 : f32
    %174 = vector.broadcast %cst_70 : f32 to vector<2x64xf32>
    %175 = arith.subf %174, %171 : vector<2x64xf32>
    %176 = arith.mulf %173, %175 : vector<2x64xf32>
    %177 = vector.extract_strided_slice %136 {offsets = [6, 0], sizes = [2, 64], strides = [1, 1]} : vector<8x64xf32> to vector<2x64xf32>
    %178 = arith.addf %176, %177 : vector<2x64xf32>
    %cst_71 = arith.constant 1.000000e+00 : f32
    %179 = vector.broadcast %cst_71 : f32 to vector<2x64xf32>
    %180 = arith.cmpf oge, %178, %179 : vector<2x64xf32>
    %181 = arith.extui %180 : vector<2x64xi1> to vector<2x64xi32>
    %182 = arith.sitofp %181 : vector<2x64xi32> to vector<2x64xf32>
    %183 = tpu.concatenate %149, %160, %171, %182 in 0 : vector<2x64xf32>, vector<2x64xf32>, vector<2x64xf32>, vector<2x64xf32> -> vector<8x64xf32>
    %184 = arith.truncf %183 : vector<8x64xf32> to vector<8x64xbf16>
    %c0_72 = arith.constant 0 : index
    %c0_73 = arith.constant 0 : index
    %185 = vector.load %arg6[%c0_72, %c0_73] : memref<48x8xbf16, #tpu.memory_space<vmem>>, vector<48x8xbf16>
    %cst_74 = arith.constant dense<0.000000e+00> : vector<48x64xf32>
    %186 = tpu.matmul %185, %184, %cst_74 {dimension_numbers = #tpu.dot_dimension_numbers<[1], [0], [0], [1], [0, 0, 1, 1], [], []>} : vector<48x8xbf16>, vector<8x64xbf16>, vector<48x64xf32> -> vector<48x64xf32>
    %187 = vector.extract_strided_slice %186 {offsets = [0, 0], sizes = [16, 64], strides = [1, 1]} : vector<48x64xf32> to vector<16x64xf32>
    %188 = arith.truncf %187 : vector<16x64xf32> to vector<16x64xbf16>
    %c0_75 = arith.constant 0 : index
    %c0_76 = arith.constant 0 : index
    %c0_77 = arith.constant 0 : index
    %189 = vector.load %arg5[%c0_75, %c0_76, %c0_77] : memref<3x64x64xbf16, #tpu.memory_space<vmem>>, vector<1x64x64xbf16>
    %190 = vector.shape_cast %189 : vector<1x64x64xbf16> to vector<64x64xbf16>
    %cst_78 = arith.constant dense<0.000000e+00> : vector<16x64xf32>
    %191 = tpu.matmul %188, %190, %cst_78 {dimension_numbers = #tpu.dot_dimension_numbers<[1], [0], [0], [1], [0, 0, 1, 1], [], []>} : vector<16x64xbf16>, vector<64x64xbf16>, vector<16x64xf32> -> vector<16x64xf32>
    %192 = vector.extract_strided_slice %186 {offsets = [16, 0], sizes = [16, 64], strides = [1, 1]} : vector<48x64xf32> to vector<16x64xf32>
    %193 = arith.truncf %192 : vector<16x64xf32> to vector<16x64xbf16>
    %c1_79 = arith.constant 1 : index
    %c0_80 = arith.constant 0 : index
    %c0_81 = arith.constant 0 : index
    %194 = vector.load %arg5[%c1_79, %c0_80, %c0_81] : memref<3x64x64xbf16, #tpu.memory_space<vmem>>, vector<1x64x64xbf16>
    %195 = vector.shape_cast %194 : vector<1x64x64xbf16> to vector<64x64xbf16>
    %cst_82 = arith.constant dense<0.000000e+00> : vector<16x64xf32>
    %196 = tpu.matmul %193, %195, %cst_82 {dimension_numbers = #tpu.dot_dimension_numbers<[1], [0], [0], [1], [0, 0, 1, 1], [], []>} : vector<16x64xbf16>, vector<64x64xbf16>, vector<16x64xf32> -> vector<16x64xf32>
    %197 = arith.addf %191, %196 : vector<16x64xf32>
    %198 = vector.extract_strided_slice %186 {offsets = [32, 0], sizes = [16, 64], strides = [1, 1]} : vector<48x64xf32> to vector<16x64xf32>
    %199 = arith.truncf %198 : vector<16x64xf32> to vector<16x64xbf16>
    %c2_83 = arith.constant 2 : index
    %c0_84 = arith.constant 0 : index
    %c0_85 = arith.constant 0 : index
    %200 = vector.load %arg5[%c2_83, %c0_84, %c0_85] : memref<3x64x64xbf16, #tpu.memory_space<vmem>>, vector<1x64x64xbf16>
    %201 = vector.shape_cast %200 : vector<1x64x64xbf16> to vector<64x64xbf16>
    %cst_86 = arith.constant dense<0.000000e+00> : vector<16x64xf32>
    %202 = tpu.matmul %199, %201, %cst_86 {dimension_numbers = #tpu.dot_dimension_numbers<[1], [0], [0], [1], [0, 0, 1, 1], [], []>} : vector<16x64xbf16>, vector<64x64xbf16>, vector<16x64xf32> -> vector<16x64xf32>
    %203 = arith.addf %197, %202 : vector<16x64xf32>
    %c2_87 = arith.constant 2 : index
    %c0_88 = arith.constant 0 : index
    %204 = vector.load %arg9[%c2_87, %c0_88] : memref<4x64xf32, #tpu.memory_space<vmem>>, vector<1x64xf32>
    %205 = vector.broadcast %204 : vector<1x64xf32> to vector<16x64xf32>
    %206 = arith.addf %203, %205 : vector<16x64xf32>
    %cst_89 = arith.constant 0.000000e+00 : f32
    %207 = vector.broadcast %cst_89 : f32 to vector<2x64xf32>
    %cst_90 = arith.constant 0.000000e+00 : f32
    %208 = vector.broadcast %cst_90 : f32 to vector<2x64xf32>
    %cst_91 = arith.constant 0.899999976 : f32
    %209 = vector.broadcast %cst_91 : f32 to vector<2x64xf32>
    %210 = arith.mulf %209, %207 : vector<2x64xf32>
    %cst_92 = arith.constant 1.000000e+00 : f32
    %211 = vector.broadcast %cst_92 : f32 to vector<2x64xf32>
    %212 = arith.subf %211, %208 : vector<2x64xf32>
    %213 = arith.mulf %210, %212 : vector<2x64xf32>
    %214 = vector.extract_strided_slice %206 {offsets = [0, 0], sizes = [2, 64], strides = [1, 1]} : vector<16x64xf32> to vector<2x64xf32>
    %215 = arith.addf %213, %214 : vector<2x64xf32>
    %cst_93 = arith.constant 1.000000e+00 : f32
    %216 = vector.broadcast %cst_93 : f32 to vector<2x64xf32>
    %217 = arith.cmpf oge, %215, %216 : vector<2x64xf32>
    %218 = arith.extui %217 : vector<2x64xi1> to vector<2x64xi32>
    %219 = arith.sitofp %218 : vector<2x64xi32> to vector<2x64xf32>
    %cst_94 = arith.constant 0.899999976 : f32
    %220 = vector.broadcast %cst_94 : f32 to vector<2x64xf32>
    %221 = arith.mulf %220, %215 : vector<2x64xf32>
    %cst_95 = arith.constant 1.000000e+00 : f32
    %222 = vector.broadcast %cst_95 : f32 to vector<2x64xf32>
    %223 = arith.subf %222, %219 : vector<2x64xf32>
    %224 = arith.mulf %221, %223 : vector<2x64xf32>
    %225 = vector.extract_strided_slice %206 {offsets = [2, 0], sizes = [2, 64], strides = [1, 1]} : vector<16x64xf32> to vector<2x64xf32>
    %226 = arith.addf %224, %225 : vector<2x64xf32>
    %cst_96 = arith.constant 1.000000e+00 : f32
    %227 = vector.broadcast %cst_96 : f32 to vector<2x64xf32>
    %228 = arith.cmpf oge, %226, %227 : vector<2x64xf32>
    %229 = arith.extui %228 : vector<2x64xi1> to vector<2x64xi32>
    %230 = arith.sitofp %229 : vector<2x64xi32> to vector<2x64xf32>
    %cst_97 = arith.constant 0.899999976 : f32
    %231 = vector.broadcast %cst_97 : f32 to vector<2x64xf32>
    %232 = arith.mulf %231, %226 : vector<2x64xf32>
    %cst_98 = arith.constant 1.000000e+00 : f32
    %233 = vector.broadcast %cst_98 : f32 to vector<2x64xf32>
    %234 = arith.subf %233, %230 : vector<2x64xf32>
    %235 = arith.mulf %232, %234 : vector<2x64xf32>
    %236 = vector.extract_strided_slice %206 {offsets = [4, 0], sizes = [2, 64], strides = [1, 1]} : vector<16x64xf32> to vector<2x64xf32>
    %237 = arith.addf %235, %236 : vector<2x64xf32>
    %cst_99 = arith.constant 1.000000e+00 : f32
    %238 = vector.broadcast %cst_99 : f32 to vector<2x64xf32>
    %239 = arith.cmpf oge, %237, %238 : vector<2x64xf32>
    %240 = arith.extui %239 : vector<2x64xi1> to vector<2x64xi32>
    %241 = arith.sitofp %240 : vector<2x64xi32> to vector<2x64xf32>
    %cst_100 = arith.constant 0.899999976 : f32
    %242 = vector.broadcast %cst_100 : f32 to vector<2x64xf32>
    %243 = arith.mulf %242, %237 : vector<2x64xf32>
    %cst_101 = arith.constant 1.000000e+00 : f32
    %244 = vector.broadcast %cst_101 : f32 to vector<2x64xf32>
    %245 = arith.subf %244, %241 : vector<2x64xf32>
    %246 = arith.mulf %243, %245 : vector<2x64xf32>
    %247 = vector.extract_strided_slice %206 {offsets = [6, 0], sizes = [2, 64], strides = [1, 1]} : vector<16x64xf32> to vector<2x64xf32>
    %248 = arith.addf %246, %247 : vector<2x64xf32>
    %cst_102 = arith.constant 1.000000e+00 : f32
    %249 = vector.broadcast %cst_102 : f32 to vector<2x64xf32>
    %250 = arith.cmpf oge, %248, %249 : vector<2x64xf32>
    %251 = arith.extui %250 : vector<2x64xi1> to vector<2x64xi32>
    %252 = arith.sitofp %251 : vector<2x64xi32> to vector<2x64xf32>
    %cst_103 = arith.constant 0.899999976 : f32
    %253 = vector.broadcast %cst_103 : f32 to vector<2x64xf32>
    %254 = arith.mulf %253, %248 : vector<2x64xf32>
    %cst_104 = arith.constant 1.000000e+00 : f32
    %255 = vector.broadcast %cst_104 : f32 to vector<2x64xf32>
    %256 = arith.subf %255, %252 : vector<2x64xf32>
    %257 = arith.mulf %254, %256 : vector<2x64xf32>
    %258 = vector.extract_strided_slice %206 {offsets = [8, 0], sizes = [2, 64], strides = [1, 1]} : vector<16x64xf32> to vector<2x64xf32>
    %259 = arith.addf %257, %258 : vector<2x64xf32>
    %cst_105 = arith.constant 1.000000e+00 : f32
    %260 = vector.broadcast %cst_105 : f32 to vector<2x64xf32>
    %261 = arith.cmpf oge, %259, %260 : vector<2x64xf32>
    %262 = arith.extui %261 : vector<2x64xi1> to vector<2x64xi32>
    %263 = arith.sitofp %262 : vector<2x64xi32> to vector<2x64xf32>
    %cst_106 = arith.constant 0.899999976 : f32
    %264 = vector.broadcast %cst_106 : f32 to vector<2x64xf32>
    %265 = arith.mulf %264, %259 : vector<2x64xf32>
    %cst_107 = arith.constant 1.000000e+00 : f32
    %266 = vector.broadcast %cst_107 : f32 to vector<2x64xf32>
    %267 = arith.subf %266, %263 : vector<2x64xf32>
    %268 = arith.mulf %265, %267 : vector<2x64xf32>
    %269 = vector.extract_strided_slice %206 {offsets = [10, 0], sizes = [2, 64], strides = [1, 1]} : vector<16x64xf32> to vector<2x64xf32>
    %270 = arith.addf %268, %269 : vector<2x64xf32>
    %cst_108 = arith.constant 1.000000e+00 : f32
    %271 = vector.broadcast %cst_108 : f32 to vector<2x64xf32>
    %272 = arith.cmpf oge, %270, %271 : vector<2x64xf32>
    %273 = arith.extui %272 : vector<2x64xi1> to vector<2x64xi32>
    %274 = arith.sitofp %273 : vector<2x64xi32> to vector<2x64xf32>
    %cst_109 = arith.constant 0.899999976 : f32
    %275 = vector.broadcast %cst_109 : f32 to vector<2x64xf32>
    %276 = arith.mulf %275, %270 : vector<2x64xf32>
    %cst_110 = arith.constant 1.000000e+00 : f32
    %277 = vector.broadcast %cst_110 : f32 to vector<2x64xf32>
    %278 = arith.subf %277, %274 : vector<2x64xf32>
    %279 = arith.mulf %276, %278 : vector<2x64xf32>
    %280 = vector.extract_strided_slice %206 {offsets = [12, 0], sizes = [2, 64], strides = [1, 1]} : vector<16x64xf32> to vector<2x64xf32>
    %281 = arith.addf %279, %280 : vector<2x64xf32>
    %cst_111 = arith.constant 1.000000e+00 : f32
    %282 = vector.broadcast %cst_111 : f32 to vector<2x64xf32>
    %283 = arith.cmpf oge, %281, %282 : vector<2x64xf32>
    %284 = arith.extui %283 : vector<2x64xi1> to vector<2x64xi32>
    %285 = arith.sitofp %284 : vector<2x64xi32> to vector<2x64xf32>
    %cst_112 = arith.constant 0.899999976 : f32
    %286 = vector.broadcast %cst_112 : f32 to vector<2x64xf32>
    %287 = arith.mulf %286, %281 : vector<2x64xf32>
    %cst_113 = arith.constant 1.000000e+00 : f32
    %288 = vector.broadcast %cst_113 : f32 to vector<2x64xf32>
    %289 = arith.subf %288, %285 : vector<2x64xf32>
    %290 = arith.mulf %287, %289 : vector<2x64xf32>
    %291 = vector.extract_strided_slice %206 {offsets = [14, 0], sizes = [2, 64], strides = [1, 1]} : vector<16x64xf32> to vector<2x64xf32>
    %292 = arith.addf %290, %291 : vector<2x64xf32>
    %cst_114 = arith.constant 1.000000e+00 : f32
    %293 = vector.broadcast %cst_114 : f32 to vector<2x64xf32>
    %294 = arith.cmpf oge, %292, %293 : vector<2x64xf32>
    %295 = arith.extui %294 : vector<2x64xi1> to vector<2x64xi32>
    %296 = arith.sitofp %295 : vector<2x64xi32> to vector<2x64xf32>
    %297 = tpu.concatenate %219, %230, %241, %252, %263, %274, %285, %296 in 0 : vector<2x64xf32>, vector<2x64xf32>, vector<2x64xf32>, vector<2x64xf32>, vector<2x64xf32>, vector<2x64xf32>, vector<2x64xf32>, vector<2x64xf32> -> vector<16x64xf32>
    %298 = arith.addf %297, %113 : vector<16x64xf32>
    %299 = arith.truncf %298 : vector<16x64xf32> to vector<16x64xbf16>
    %c0_115 = arith.constant 0 : index
    %c0_116 = arith.constant 0 : index
    %300 = vector.load %arg8[%c0_115, %c0_116] : memref<96x16xbf16, #tpu.memory_space<vmem>>, vector<96x16xbf16>
    %cst_117 = arith.constant dense<0.000000e+00> : vector<96x64xf32>
    %301 = tpu.matmul %300, %299, %cst_117 {dimension_numbers = #tpu.dot_dimension_numbers<[1], [0], [0], [1], [0, 0, 1, 1], [], []>} : vector<96x16xbf16>, vector<16x64xbf16>, vector<96x64xf32> -> vector<96x64xf32>
    %302 = vector.extract_strided_slice %301 {offsets = [0, 0], sizes = [32, 64], strides = [1, 1]} : vector<96x64xf32> to vector<32x64xf32>
    %303 = arith.truncf %302 : vector<32x64xf32> to vector<32x64xbf16>
    %c0_118 = arith.constant 0 : index
    %c0_119 = arith.constant 0 : index
    %c0_120 = arith.constant 0 : index
    %304 = vector.load %arg7[%c0_118, %c0_119, %c0_120] : memref<3x64x64xbf16, #tpu.memory_space<vmem>>, vector<1x64x64xbf16>
    %305 = vector.shape_cast %304 : vector<1x64x64xbf16> to vector<64x64xbf16>
    %cst_121 = arith.constant dense<0.000000e+00> : vector<32x64xf32>
    %306 = tpu.matmul %303, %305, %cst_121 {dimension_numbers = #tpu.dot_dimension_numbers<[1], [0], [0], [1], [0, 0, 1, 1], [], []>} : vector<32x64xbf16>, vector<64x64xbf16>, vector<32x64xf32> -> vector<32x64xf32>
    %307 = vector.extract_strided_slice %301 {offsets = [32, 0], sizes = [32, 64], strides = [1, 1]} : vector<96x64xf32> to vector<32x64xf32>
    %308 = arith.truncf %307 : vector<32x64xf32> to vector<32x64xbf16>
    %c1_122 = arith.constant 1 : index
    %c0_123 = arith.constant 0 : index
    %c0_124 = arith.constant 0 : index
    %309 = vector.load %arg7[%c1_122, %c0_123, %c0_124] : memref<3x64x64xbf16, #tpu.memory_space<vmem>>, vector<1x64x64xbf16>
    %310 = vector.shape_cast %309 : vector<1x64x64xbf16> to vector<64x64xbf16>
    %cst_125 = arith.constant dense<0.000000e+00> : vector<32x64xf32>
    %311 = tpu.matmul %308, %310, %cst_125 {dimension_numbers = #tpu.dot_dimension_numbers<[1], [0], [0], [1], [0, 0, 1, 1], [], []>} : vector<32x64xbf16>, vector<64x64xbf16>, vector<32x64xf32> -> vector<32x64xf32>
    %312 = arith.addf %306, %311 : vector<32x64xf32>
    %313 = vector.extract_strided_slice %301 {offsets = [64, 0], sizes = [32, 64], strides = [1, 1]} : vector<96x64xf32> to vector<32x64xf32>
    %314 = arith.truncf %313 : vector<32x64xf32> to vector<32x64xbf16>
    %c2_126 = arith.constant 2 : index
    %c0_127 = arith.constant 0 : index
    %c0_128 = arith.constant 0 : index
    %315 = vector.load %arg7[%c2_126, %c0_127, %c0_128] : memref<3x64x64xbf16, #tpu.memory_space<vmem>>, vector<1x64x64xbf16>
    %316 = vector.shape_cast %315 : vector<1x64x64xbf16> to vector<64x64xbf16>
    %cst_129 = arith.constant dense<0.000000e+00> : vector<32x64xf32>
    %317 = tpu.matmul %314, %316, %cst_129 {dimension_numbers = #tpu.dot_dimension_numbers<[1], [0], [0], [1], [0, 0, 1, 1], [], []>} : vector<32x64xbf16>, vector<64x64xbf16>, vector<32x64xf32> -> vector<32x64xf32>
    %318 = arith.addf %312, %317 : vector<32x64xf32>
    %c3 = arith.constant 3 : index
    %c0_130 = arith.constant 0 : index
    %319 = vector.load %arg9[%c3, %c0_130] : memref<4x64xf32, #tpu.memory_space<vmem>>, vector<1x64xf32>
    %320 = vector.broadcast %319 : vector<1x64xf32> to vector<32x64xf32>
    %321 = arith.addf %318, %320 : vector<32x64xf32>
    %c0_131 = arith.constant 0 : index
    %c0_132 = arith.constant 0 : index
    %322 = vector.load %arg10[%c0_131, %c0_132] : memref<32x32xf32, #tpu.memory_space<vmem>>, vector<32x32xf32>
    %cst_133 = arith.constant dense<0.000000e+00> : vector<32x64xf32>
    %323 = tpu.matmul %322, %321, %cst_133 {dimension_numbers = #tpu.dot_dimension_numbers<[1], [0], [0], [1], [0, 0, 1, 1], [], []>} : vector<32x32xf32>, vector<32x64xf32>, vector<32x64xf32> -> vector<32x64xf32>
    %c0_134 = arith.constant 0 : index
    %c0_135 = arith.constant 0 : index
    %324 = vector.load %arg11[%c0_134, %c0_135] : memref<32x64xf32, #tpu.memory_space<vmem>>, vector<32x64xf32>
    tpu.vector_store %arg11[%c0_134, %c0_135], %323 {strides = array<i32>} : memref<32x64xf32, #tpu.memory_space<vmem>>, vector<32x64xf32>,
    return
  }
}

</mosaic_0001>

<bundles_post_ra>
// kernel: unet_snn_forward.1
= control target key start
LH: loop header
LB: loop body
LE: loop exit
PB: predicated region body
PF: predicated region fallthrough
CT: control target
= control target key end

     0   :  { %16 = vsyncpa [#allocation3], 0  ;;  %s2055_s0 = inlined_call_operand.vmem [shape: bf16[32,64], index: 0, kind: input, shape index: {}]   ;;  %s2056_s1 = inlined_call_operand.vmem [shape: bf16[3,64,64], index: 1, kind: input, shape index: {}]   ;;  %s2057_s2 = inlined_call_operand.vmem [shape: bf16[48,32], index: 2, kind: input, shape index: {}]   ;;  %s2058_s3 = inlined_call_operand.hbm [shape: bf16[3,64,64], index: 3, kind: input, shape index: {}]   ;;  %s2059_s4 = inlined_call_operand.vmem [shape: bf16[24,16], index: 4, kind: input, shape index: {}]   ;;  %s2060_s5 = inlined_call_operand.hbm [shape: bf16[3,64,64], index: 5, kind: input, shape index: {}]   ;;  %s2061_s6 = inlined_call_operand.vmem [shape: bf16[48,8], index: 6, kind: input, shape index: {}]   ;;  %s2062_s7 = inlined_call_operand.hbm [shape: bf16[3,64,64], index: 7, kind: input, shape index: {}]   ;;  %s2063_s8 = inlined_call_operand.vmem [shape: bf16[96,16], index: 8, kind: input, shape index: {}]   ;;  %s2064_s9 = inlined_call_operand.vmem [shape: f32[4,64], index: 9, kind: input, shape index: {}]   ;;  %s2065_s10 = inlined_call_operand.vmem [shape: f32[32,32], index: 10, kind: input, shape index: {}]   ;;  %s2066_s11 = inlined_call_operand.vmem [shape: f32[32,64], index: 11, kind: output, shape index: {}]  }
   0x1   :  { %17 = vsyncpa [#allocation5], 0  ;;  %s43_s19 = sshll.u32 %s2060_s5, 4  ;;  %s1774_s20 = smov [#allocation4]   ;;  %s44_s19 = int_to_ptr.hbm [resolvable:$true] %s43_s19 }
   0x2   :  { %s45_s21 = sshll.u32 %s1774_s20, 4  ;;  %s28_s24 = sshll.u32 %s2058_s3, 4  ;;  %s46_s21 = int_to_ptr.vmem [resolvable:$true] %s45_s21  ;;  %s29_s24 = int_to_ptr.hbm [resolvable:$true] %s28_s24 }
   0x3   :  { %s1775_s25 = smov 64   ;;  %s1776_s26 = smov 4  }
   0x4   :  { %51 = dma.hbm_to_vmem [thread:$0]  %s44_s19, 1536, %s46_s21, [#allocation5], %s1775_s25, %s1775_s25, %s1776_s26  }
   0x5   :  { %s1777_s27 = smov [#allocation2]   ;;  %s58_s12 = sshll.u32 %s2062_s7, 4  ;;  %s59_s12 = int_to_ptr.hbm [resolvable:$true] %s58_s12 }
   0x6   :  { %s30_s28 = sshll.u32 %s1777_s27, 4  ;;  %s1778_s5 = smov [#allocation6]   ;;  %s31_s28 = int_to_ptr.vmem [resolvable:$true] %s30_s28 }
   0x7   :  { %36 = dma.hbm_to_vmem [thread:$0]  %s29_s24, 1536, %s31_s28, [#allocation3], %s1775_s25, %s1775_s25, %s1776_s26  }
   0x8   :  { %s60_s13 = sshll.u32 %s1778_s5, 4  ;;  %s61_s13 = int_to_ptr.vmem [resolvable:$true] %s60_s13 }
   0x9   :  { %66 = dma.hbm_to_vmem [thread:$0]  %s59_s12, 1536, %s61_s13, [#allocation5], %s1775_s25, %s1775_s25, %s1776_s26  }
   0xa   :  { %1770 = dma.done.wait [#allocation3], 1536  }
   0xb   :  { %1771 = vsyncadd [#allocation3], 4294965760 }
   0xc   :  { %1772 = dma.done.wait [#allocation5], 3072  }
   0xd   :  { %1773 = vsyncadd [#allocation5], 4294964224  ;;  %v1620_v0 = vld [vmem:[%s2055_s0 + $0x8] sm:$0xff]  ;;  %v1619_v1 = vld [vmem:[%s2055_s0] sm:$0xff]  ;;  %vm123_vm0 = vcmask 261120   ;;  %vm200_vm1 = vcmask 523264  }
   0xe   :  { %139 = vmatpush.bf16.msra.mxu0 %v1620_v0  ;;  %1682 = vmatpush.bf16.msra.mxu2 %v1620_v0  ;;  %v1627_v2 = vld [vmem:[%s2056_s1 + $0x18] sm:$0xff]  ;;  %v1621_v3 = vld [vmem:[%s2057_s2] sm:$0xff]  ;;  %v1622_v4 = vld [vmem:[%s2057_s2 + $0x8] sm:$0xff]  ;;  %v1779_v33 = vmov 0.0   ;;  %vm401_vm9 = vcmask 1041408   ;;  %vm403_vm11 = vcmask 1043456  }
   0xf   :  { %v1623_v5 = vld [vmem:[%s2057_s2 + $0x10] sm:$0xff]  ;;  %v1631_v7 = vld [vmem:[%s2056_s1 + $0x38] sm:$0xff]  ;;  %v1625_v8 = vld [vmem:[%s2056_s1 + $0x8] sm:$0xff]  ;;  %vm405_vm12 = vcmask 1045504   ;;  %vm422_vm13 = vcmask 130048  }
  0x10   :  { %v1626_v6 = vld [vmem:[%s2056_s1 + $0x10] sm:$0xff]  ;;  %208 = vmatpush.bf16.msra.mxu1 %v1631_v7  ;;  %v1624_v10 = vld [vmem:[%s2056_s1] sm:$0xff]  ;;  %v1629_v11 = vld [vmem:[%s2056_s1 + $0x28] sm:$0xff] }
  0x11   :  { %v1630_v9 = vld [vmem:[%s2056_s1 + $0x30] sm:$0xff]  ;;  %v1628_v12 = vld [vmem:[%s2056_s1 + $0x20] sm:$0xff]  ;;  %v1635_v13 = vld [vmem:[%s2056_s1 + $0x58] sm:$0xff] }
  0x12   :  { %140 = vmatpush.bf16.msra.mxu0 %v1619_v1  ;;  %1683 = vmatpush.bf16.msra.mxu2 %v1619_v1  ;;  %v1634_v14 = vld [vmem:[%s2056_s1 + $0x50] sm:$0xff]  ;;  %v1633_v15 = vld [vmem:[%s2056_s1 + $0x48] sm:$0xff]  ;;  %v1632_v16 = vld [vmem:[%s2056_s1 + $0x40] sm:$0xff] }
  0x13   :  { %300 = vmatpush.bf16.msra.mxu3 %v1635_v13  ;;  %v1694_v29 = vld [vmem:[%s2064_s9] ss:$0 sm:$0xff] }
  0x14   :  { %209 = vmatpush.bf16.msra.mxu1 %v1630_v9 }
  0x15   :  { %1318 = vmatmul.msk.bf16.vlgmr.msra.gmra.mxu0 %vm123_vm0, %v1621_v3  ;;  %1319 = vmatmul.msk.bf16.vlgmr.msra.gmra.mxu2 %vm123_vm0, %v1622_v4 }
  0x16   :  { %249 = vmatpush.bf16.msrb.mxu2 %v1627_v2 }
  0x17   :  { %301 = vmatpush.bf16.msra.mxu3 %v1634_v14  ;;  %v1640_v14 = vld [vmem:[#allocation2 + $0x18] sm:$0xff] }
  0x18   :  { %210 = vmatpush.bf16.msra.mxu1 %v1629_v11 }
  0x1a   :  { %250 = vmatpush.bf16.msrb.mxu2 %v1626_v6 }
  0x1b   :  { %302 = vmatpush.bf16.msra.mxu3 %v1633_v15  ;;  %v1644_v15 = vld [vmem:[#allocation2 + $0x38] sm:$0xff] }
  0x1c   :  { %211 = vmatpush.bf16.msra.mxu1 %v1628_v12 }
  0x1e   :  { %251 = vmatpush.bf16.msrb.mxu2 %v1625_v8 }
  0x1f   :  { %303 = vmatpush.bf16.msra.mxu3 %v1632_v16 }
  0x22   :  { %252 = vmatpush.bf16.msrb.mxu2 %v1624_v10 }
  0x23   :  { %537 = vmatpush.bf16.msrb.mxu3 %v1640_v14 }
  0x25   :  { %1320 = vmatmul.msk.bf16.gmra.mxu2 %vm123_vm0, %v1623_v5 }
  0x26   :  { %497 = vmatpush.bf16.msra.mxu2 %v1644_v15 }
  0x92   :  { %v142_v17 = vpop.f32.mrf.mxu0 }
  0x98   :  { %v147_v18 = vpop.f32.mrf.mxu2 }
  0x9a   :  { %v144_v19 = vpop.f32.mrf.mxu0 }
  0x9b   :  { %v157_v20 = vpack.c.bf16 %v144_v19, %v142_v17 }
  0x9d   :  { %1362 = vmatmul.msk.bf16.vlgmr.msrb.gmra.mxu2 %vm200_vm1, %v157_v20 }
  0xa0   :  { %v149_v21 = vpop.f32.mrf.mxu2 }
  0xa1   :  { %v166_v22 = vpack.c.bf16 %v149_v21, %v147_v18  ;;  %v1639_v18 = vld [vmem:[#allocation2 + $0x10] sm:$0xff] }
  0xa2   :  { %538 = vmatpush.bf16.msrb.mxu3 %v1639_v18 }
  0xa3   :  { %1345 = vmatmul.msk.bf16.vlgmr.msra.gmra.mxu1 %vm200_vm1, %v166_v22 }
  0xa8   :  { %v152_v23 = vpop.f32.mrf.mxu2 }
  0xb0   :  { %v154_v24 = vpop.f32.mrf.mxu2 }
  0xb1   :  { %v259_v25 = vpack.c.bf16 %v154_v24, %v152_v23 }
  0xb3   :  { %1387 = vmatmul.msk.bf16.vlgmr.msra.gmra.mxu3 %vm200_vm1, %v259_v25  ;;  %v1638_v25 = vld [vmem:[#allocation2 + $0x8] sm:$0xff] }
  0xb4   :  { %539 = vmatpush.bf16.msrb.mxu3 %v1638_v25 }
 0x120   :  { %v213_v26 = vpop.f32.mrf.mxu1  ;;  %v254_v27 = vpop.f32.mrf.mxu2 }
 0x121   :  { %v255_v28 = vadd.f32 %v254_v27, %v213_v26 }
 0x128   :  { %v215_v49 = vpop.f32.mrf.mxu1  ;;  %v256_v50 = vpop.f32.mrf.mxu2 }
 0x129   :  { %v257_v54 = vadd.f32 %v256_v50, %v215_v49 }
 0x136   :  { %v305_v30 = vpop.f32.mrf.mxu3 }
 0x137   :  { %v310_v31 = vadd.f32 %v305_v30, %v255_v28 }
 0x139   :  { %v314_v32 = vadd.f32 %v1694_v29, %v310_v31 }
 0x13b   :  { %vm317_vm2 = vcmp.ge.f32.partialorder %v314_v32, 1.0  ;;  %v320_v35 = vmul.f32 0.9, %v314_v32  ;;  %v324_v37 = vrot.slane %v314_v32, 2  ;;  %v333_v43 = vrot.slane %v314_v32, 4 }
 0x13c   :  { %v1910_v34 = vsel %vm317_vm2, 1.0, %v1779_v33  ;;  %v342_v52 = vrot.slane %v314_v32, 6 }
 0x13d   :  { %v321_v36 = vsub.f32 1.0, %v1910_v34 }
 0x13e   :  { %v307_v53 = vpop.f32.mrf.mxu3 }
 0x13f   :  { %v322_v38 = vmul.f32 %v321_v36, %v320_v35  ;;  %v311_v56 = vadd.f32 %v307_v53, %v257_v54 }
 0x141   :  { %v326_v39 = vadd.f32 %v324_v37, %v322_v38  ;;  %v315_v60 = vadd.f32 %v1694_v29, %v311_v56  ;;  %v413_v37 = vld [vmem:[%s2059_s4 + $0x8] sm:$0xf] }
 0x142   :  { %v419_v38 = vunpack.c.l.b16 %v413_v37  ;;  %v1652_v37 = vld [vmem:[#allocation4] sm:$0xff] }
 0x143   :  { %vm327_vm3 = vcmp.ge.f32.partialorder %v326_v39, 1.0  ;;  %v330_v41 = vmul.f32 0.9, %v326_v39  ;;  %v359_v2 = vrot.slane %v315_v60, 2  ;;  %v368_v8 = vrot.slane %v315_v60, 4 }
 0x144   :  { %v1914_v40 = vsel %vm327_vm3, 1.0, %v1779_v33  ;;  %v377_v16 = vrot.slane %v315_v60, 6  ;;  %v421_v39 = vpack.c.b16 %v419_v38, %v419_v38  ;;  %v1659_v38 = vld [vmem:[#allocation4 + $0x38] sm:$0xff] }
 0x145   :  { %v331_v42 = vsub.f32 1.0, %v1914_v40  ;;  %v384_v20 = vrot.slane %v1914_v40, 6  ;;  %v1643_v40 = vld [vmem:[#allocation2 + $0x30] sm:$0xff]  ;;  %753 = vmatpush.bf16.msrb.mxu0 %v1659_v38 }
 0x146   :  { %498 = vmatpush.bf16.msra.mxu2 %v1643_v40  ;;  %v1657_v40 = vld [vmem:[#allocation4 + $0x28] sm:$0xff] }
 0x147   :  { %v332_v44 = vmul.f32 %v331_v42, %v330_v41  ;;  %v402_v28 = vsel %vm401_vm9, %v1910_v34, %v384_v20  ;;  %v1636_v34 = vld [vmem:[%s2059_s4] sm:$0xff]  ;;  %v1642_v42 = vld [vmem:[#allocation2 + $0x28] sm:$0xff] }
 0x148   :  { %v1637_v41 = vld [vmem:[#allocation2] sm:$0xff] }
 0x149   :  { %v335_v45 = vadd.f32 %v333_v43, %v332_v44  ;;  %540 = vmatpush.bf16.msrb.mxu3 %v1637_v41  ;;  %v1641_v43 = vld [vmem:[#allocation2 + $0x20] sm:$0xff]  ;;  %v1648_v44 = vld [vmem:[#allocation2 + $0x58] sm:$0xff] }
 0x14a   :  { %499 = vmatpush.bf16.msra.mxu2 %v1642_v42  ;;  %v1656_v41 = vld [vmem:[#allocation4 + $0x20] sm:$0xff]  ;;  %v1663_v42 = vld [vmem:[#allocation4 + $0x58] sm:$0xff] }
 0x14b   :  { %vm336_vm4 = vcmp.ge.f32.partialorder %v335_v45, 1.0  ;;  %v339_v47 = vmul.f32 0.9, %v335_v45  ;;  %v1647_v45 = vld [vmem:[#allocation2 + $0x50] sm:$0xff] }
 0x14c   :  { %v1390_v46 = vsel %vm336_vm4, 1.0, %v1779_v33  ;;  %vm666_vm4 = vcmask 64512  }
 0x14d   :  { %v340_v48 = vsub.f32 1.0, %v1390_v46  ;;  %v387_v22 = vrot.slane %v1390_v46, 4  ;;  %v1646_v46 = vld [vmem:[#allocation2 + $0x48] sm:$0xff] }
 0x14e   :  { %500 = vmatpush.bf16.msra.mxu2 %v1641_v43  ;;  %v1662_v43 = vld [vmem:[#allocation4 + $0x50] sm:$0xff] }
 0x14f   :  { %v341_v51 = vmul.f32 %v340_v48, %v339_v47  ;;  %v404_v30 = vsel %vm403_vm11, %v402_v28, %v387_v22  ;;  %v1645_v47 = vld [vmem:[#allocation2 + $0x40] sm:$0xff] }
 0x150   :  { %v1649_v28 = vld [vmem:[%s2061_s6] sm:$0xff] }
 0x151   :  { %v344_v55 = vadd.f32 %v342_v52, %v341_v51 }
 0x152   :  { %587 = vmatpush.bf16.msrb.mxu2 %v1648_v44 }
 0x153   :  { %vm345_vm5 = vcmp.ge.f32.partialorder %v344_v55, 1.0  ;;  %v348_v58 = vmul.f32 0.9, %v344_v55 }
 0x154   :  { %v1391_v57 = vsel %vm345_vm5, 1.0, %v1779_v33 }
 0x155   :  { %v349_v59 = vsub.f32 1.0, %v1391_v57  ;;  %v390_v24 = vrot.slane %v1391_v57, 2 }
 0x156   :  { %588 = vmatpush.bf16.msrb.mxu2 %v1647_v45  ;;  %v1661_v45 = vld [vmem:[#allocation4 + $0x48] sm:$0xff] }
 0x157   :  { %v350_v61 = vmul.f32 %v349_v59, %v348_v58  ;;  %v1930_v32 = vsel %vm405_vm12, %v404_v30, %v390_v24  ;;  %v1650_v30 = vld [vmem:[%s2061_s6 + $0x8] sm:$0xff] }
 0x159   :  { %v351_v62 = vadd.f32 %v350_v61, %v315_v60  ;;  %v1695_v60 = vld [vmem:[%s2064_s9 + $0x1] ss:$0 sm:$0xff] }
 0x15a   :  { %589 = vmatpush.bf16.msrb.mxu2 %v1646_v46  ;;  %v1660_v46 = vld [vmem:[#allocation4 + $0x40] sm:$0xff] }
 0x15b   :  { %vm352_vm6 = vcmp.ge.f32.partialorder %v351_v62, 1.0  ;;  %v355_v0 = vmul.f32 0.9, %v351_v62 }
 0x15c   :  { %v1392_v63 = vsel %vm352_vm6, 1.0, %v1779_v33 }
 0x15d   :  { %v356_v1 = vsub.f32 1.0, %v1392_v63 }
 0x15e   :  { %590 = vmatpush.bf16.msrb.mxu2 %v1645_v47 }
 0x15f   :  { %v357_v3 = vmul.f32 %v356_v1, %v355_v0 }
 0x161   :  { %v361_v4 = vadd.f32 %v359_v2, %v357_v3 }
 0x163   :  { %vm362_vm7 = vcmp.ge.f32.partialorder %v361_v4, 1.0  ;;  %v365_v6 = vmul.f32 0.9, %v361_v4 }
 0x164   :  { %v1393_v5 = vsel %vm362_vm7, 1.0, %v1779_v33 }
 0x165   :  { %v366_v7 = vsub.f32 1.0, %v1393_v5  ;;  %v393_v21 = vrot.slane %v1393_v5, 6 }
 0x167   :  { %v367_v9 = vmul.f32 %v366_v7, %v365_v6  ;;  %v407_v29 = vsel %vm401_vm9, %v1392_v63, %v393_v21 }
 0x169   :  { %v370_v10 = vadd.f32 %v368_v8, %v367_v9 }
 0x16b   :  { %vm371_vm8 = vcmp.ge.f32.partialorder %v370_v10, 1.0  ;;  %v374_v12 = vmul.f32 0.9, %v370_v10 }
 0x16c   :  { %v1394_v11 = vsel %vm371_vm8, 1.0, %v1779_v33 }
 0x16d   :  { %v375_v13 = vsub.f32 1.0, %v1394_v11  ;;  %v396_v23 = vrot.slane %v1394_v11, 4 }
 0x16f   :  { %v376_v17 = vmul.f32 %v375_v13, %v374_v12  ;;  %v408_v31 = vsel %vm403_vm11, %v407_v29, %v396_v23  ;;  %v1655_v29 = vld [vmem:[#allocation4 + $0x18] sm:$0xff] }
 0x171   :  { %v379_v19 = vadd.f32 %v377_v16, %v376_v17 }
 0x173   :  { %vm380_vm10 = vcmp.ge.f32.partialorder %v379_v19, 1.0 }
 0x174   :  { %v1395_v26 = vsel %vm380_vm10, 1.0, %v1779_v33 }
 0x175   :  { %v399_v27 = vrot.slane %v1395_v26, 2 }
 0x177   :  { %v1933_v35 = vsel %vm405_vm12, %v408_v31, %v399_v27  ;;  %v1651_v31 = vld [vmem:[%s2061_s6 + $0x10] sm:$0xff] }
 0x178   :  { %v410_v36 = vpack.c.bf16 %v1933_v35, %v1930_v32 }
 0x17a   :  { %436 = vmatpush.bf16.msrb.mxu1 %v410_v36  ;;  %v1654_v36 = vld [vmem:[#allocation4 + $0x10] sm:$0xff] }
 0x17d   :  { %1400 = vmatmul.msk.bf16.vlgmr.msrb.gmra.mxu1 %vm422_vm13, %v1636_v34  ;;  %v1653_v34 = vld [vmem:[#allocation4 + $0x8] sm:$0xff] }
 0x17e   :  { %794 = vmatpush.bf16.msra.mxu1 %v1655_v29 }
 0x182   :  { %795 = vmatpush.bf16.msra.mxu1 %v1654_v36 }
 0x186   :  { %796 = vmatpush.bf16.msra.mxu1 %v1653_v34 }
 0x18a   :  { %797 = vmatpush.bf16.msra.mxu1 %v1652_v37 }
 0x18d   :  { %1401 = vmatmul.msk.bf16.gmra.mxu1 %vm422_vm13, %v421_v39  ;;  %v1658_v39 = vld [vmem:[#allocation4 + $0x30] sm:$0xff] }
 0x18e   :  { %754 = vmatpush.bf16.msrb.mxu0 %v1658_v39 }
 0x192   :  { %755 = vmatpush.bf16.msrb.mxu0 %v1657_v40 }
 0x196   :  { %756 = vmatpush.bf16.msrb.mxu0 %v1656_v41 }
 0x1fa   :  { %v438_v48 = vpop.f32.mrf.mxu1 }
 0x1fb   :  { %v447_v49 = vpack.c.bf16 %v438_v48, %v438_v48 }
 0x1fd   :  { %1435 = vmatmul.msk.bf16.vlgmr.msrb.gmra.mxu3 %vm200_vm1, %v447_v49 }
 0x202   :  { %v440_v50 = vpop.f32.mrf.mxu1 }
 0x203   :  { %v456_v51 = vpack.c.bf16 %v440_v50, %v440_v50 }
 0x205   :  { %1418 = vmatmul.msk.bf16.vlgmr.msra.gmra.mxu2 %vm200_vm1, %v456_v51 }
 0x206   :  { %845 = vmatpush.bf16.msra.mxu2 %v1663_v42 }
 0x20a   :  { %v443_v52 = vpop.f32.mrf.mxu1  ;;  %846 = vmatpush.bf16.msra.mxu2 %v1662_v43 }
 0x20b   :  { %v546_v53 = vpack.c.bf16 %v443_v52, %v443_v52 }
 0x20e   :  { %847 = vmatpush.bf16.msra.mxu2 %v1661_v45 }
 0x212   :  { %v445_v54 = vpop.f32.mrf.mxu1  ;;  %848 = vmatpush.bf16.msra.mxu2 %v1660_v46 }
 0x215   :  { %1452 = vmatmul.msk.bf16.vlgmr.msrb.gmra.mxu2 %vm200_vm1, %v546_v53 }
 0x280   :  { %v542_v55 = vpop.f32.mrf.mxu3 }
 0x288   :  { %v502_v56 = vpop.f32.mrf.mxu2  ;;  %v544_v57 = vpop.f32.mrf.mxu3 }
 0x289   :  { %v543_v59 = vadd.f32 %v542_v55, %v502_v56 }
 0x290   :  { %v504_v58 = vpop.f32.mrf.mxu2 }
 0x291   :  { %v1696_v58 = vld [vmem:[%s2064_s9 + $0x2] ss:$0 sm:$0xff] }
 0x298   :  { %v592_v61 = vpop.f32.mrf.mxu2 }
 0x299   :  { %v596_v62 = vadd.f32 %v592_v61, %v543_v59 }
 0x29b   :  { %v599_v63 = vadd.f32 %v1695_v60, %v596_v62 }
 0x29d   :  { %vm601_vm14 = vcmp.ge.f32.partialorder %v599_v63, 1.0  ;;  %v604_v1 = vmul.f32 0.9, %v599_v63  ;;  %v608_v4 = vrot.slane %v599_v63, 2  ;;  %v617_v10 = vrot.slane %v599_v63, 4 }
 0x29e   :  { %v1453_v0 = vsel %vm601_vm14, 1.0, %v1779_v33  ;;  %v626_v17 = vrot.slane %v599_v63, 6 }
 0x29f   :  { %v605_v2 = vsub.f32 1.0, %v1453_v0 }
 0x2a0   :  { %v594_v3 = vpop.f32.mrf.mxu2 }
 0x2a1   :  { %v606_v5 = vmul.f32 %v605_v2, %v604_v1 }
 0x2a3   :  { %v610_v6 = vadd.f32 %v608_v4, %v606_v5 }
 0x2a5   :  { %vm611_vm15 = vcmp.ge.f32.partialorder %v610_v6, 1.0  ;;  %v614_v8 = vmul.f32 0.9, %v610_v6 }
 0x2a6   :  { %v1454_v7 = vsel %vm611_vm15, 1.0, %v1779_v33 }
 0x2a7   :  { %v615_v9 = vsub.f32 1.0, %v1454_v7  ;;  %v633_v19 = vrot.slane %v1454_v7, 6 }
 0x2a9   :  { %v616_v11 = vmul.f32 %v615_v9, %v614_v8  ;;  %v641_v23 = vsel %vm401_vm9, %v1453_v0, %v633_v19 }
 0x2ab   :  { %v619_v12 = vadd.f32 %v617_v10, %v616_v11 }
 0x2ad   :  { %vm620_vm2 = vcmp.ge.f32.partialorder %v619_v12, 1.0  ;;  %v623_v14 = vmul.f32 0.9, %v619_v12 }
 0x2ae   :  { %v1455_v13 = vsel %vm620_vm2, 1.0, %v1779_v33 }
 0x2af   :  { %v624_v15 = vsub.f32 1.0, %v1455_v13  ;;  %v636_v20 = vrot.slane %v1455_v13, 4 }
 0x2b1   :  { %v625_v16 = vmul.f32 %v624_v15, %v623_v14  ;;  %v642_v24 = vsel %vm403_vm11, %v641_v23, %v636_v20 }
 0x2b3   :  { %v628_v18 = vadd.f32 %v626_v17, %v625_v16 }
 0x2b5   :  { %vm629_vm3 = vcmp.ge.f32.partialorder %v628_v18, 1.0 }
 0x2b6   :  { %v1456_v21 = vsel %vm629_vm3, 1.0, %v1779_v33 }
 0x2b7   :  { %v639_v22 = vrot.slane %v1456_v21, 2 }
 0x2b9   :  { %v643_v25 = vsel %vm405_vm12, %v642_v24, %v639_v22 }
 0x2ba   :  { %v644_v26 = vpack.c.bf16 %v643_v25, %v643_v25 }
 0x2bc   :  { %v677_v27 = vsel %vm403_vm11, %v644_v26, 0 }
 0x2bd   :  { %686 = vmatpush.bf16.msra.mxu3 %v677_v27 }
 0x2c0   :  { %1469 = vmatmul.msk.bf16.vlgmr.msra.gmra.mxu3 %vm666_vm4, %v1649_v28 }
 0x2d0   :  { %1470 = vmatmul.msk.bf16.gmra.mxu3 %vm666_vm4, %v1650_v30 }
 0x2e0   :  { %1471 = vmatmul.msk.bf16.gmra.mxu3 %vm666_vm4, %v1651_v31 }
 0x343   :  { %v688_v44 = vpop.f32.mrf.mxu3 }
 0x34b   :  { %v690_v47 = vpop.f32.mrf.mxu3 }
 0x34c   :  { %v703_v48 = vpack.c.bf16 %v690_v47, %v688_v44 }
 0x34e   :  { %1505 = vmatmul.msk.bf16.vlgmr.msra.gmra.mxu1 %vm200_vm1, %v703_v48 }
 0x353   :  { %v693_v49 = vpop.f32.mrf.mxu3 }
 0x35b   :  { %v695_v50 = vpop.f32.mrf.mxu3 }
 0x35c   :  { %v712_v51 = vpack.c.bf16 %v695_v50, %v693_v49 }
 0x35e   :  { %1488 = vmatmul.msk.bf16.vlgmr.msrb.gmra.mxu0 %vm200_vm1, %v712_v51 }
 0x363   :  { %v698_v52 = vpop.f32.mrf.mxu3 }
 0x36b   :  { %v700_v53 = vpop.f32.mrf.mxu3 }
 0x36c   :  { %v804_v54 = vpack.c.bf16 %v700_v53, %v698_v52 }
 0x36e   :  { %1522 = vmatmul.msk.bf16.vlgmr.msra.gmra.mxu2 %vm200_vm1, %v804_v54 }
 0x3cb   :  { %v799_v56 = vpop.f32.mrf.mxu1 }
 0x3d3   :  { %v801_v16 = vpop.f32.mrf.mxu1 }
 0x3db   :  { %v758_v55 = vpop.f32.mrf.mxu0 }
 0x3dc   :  { %v800_v57 = vadd.f32 %v799_v56, %v758_v55 }
 0x3e3   :  { %v760_v13 = vpop.f32.mrf.mxu0 }
 0x3e4   :  { %v802_v18 = vadd.f32 %v801_v16, %v760_v13 }
 0x3f1   :  { %v850_v59 = vpop.f32.mrf.mxu2 }
 0x3f2   :  { %v855_v60 = vadd.f32 %v850_v59, %v800_v57 }
 0x3f4   :  { %v859_v61 = vadd.f32 %v1696_v58, %v855_v60 }
 0x3f6   :  { %vm862_vm5 = vcmp.ge.f32.partialorder %v859_v61, 1.0  ;;  %v865_v63 = vmul.f32 0.9, %v859_v61  ;;  %v869_v2 = vrot.slane %v859_v61, 2  ;;  %v878_v8 = vrot.slane %v859_v61, 4 }
 0x3f7   :  { %v1523_v62 = vsel %vm862_vm5, 1.0, %v1779_v33  ;;  %v887_v14 = vrot.slane %v859_v61, 6 }
 0x3f8   :  { %v866_v0 = vsub.f32 1.0, %v1523_v62 }
 0x3f9   :  { %v852_v17 = vpop.f32.mrf.mxu2 }
 0x3fa   :  { %v867_v1 = vmul.f32 %v866_v0, %v865_v63  ;;  %v856_v20 = vadd.f32 %v852_v17, %v802_v18  ;;  %v1680_v18 = vld [vmem:[#allocation6 + $0x50] sm:$0xff] }
 0x3fc   :  { %v871_v3 = vadd.f32 %v869_v2, %v867_v1  ;;  %v860_v24 = vadd.f32 %v1696_v58, %v856_v20  ;;  %v1673_v1 = vld [vmem:[#allocation6 + $0x18] sm:$0xff]  ;;  %v1668_v2 = vld [vmem:[%s2063_s8 + $0x20] sm:$0xff]  ;;  %v1679_v20 = vld [vmem:[#allocation6 + $0x48] sm:$0xff] }
 0x3fd   :  { %1158 = vmatpush.bf16.msrb.mxu2 %v1673_v1 }
 0x3fe   :  { %vm872_vm6 = vcmp.ge.f32.partialorder %v871_v3, 1.0  ;;  %v875_v5 = vmul.f32 0.9, %v871_v3  ;;  %v904_v31 = vrot.slane %v860_v24, 2  ;;  %v913_v40 = vrot.slane %v860_v24, 4  ;;  %v1669_v3 = vld [vmem:[%s2063_s8 + $0x28] sm:$0xff] }
 0x3ff   :  { %v1524_v4 = vsel %vm872_vm6, 1.0, %v1779_v33  ;;  %v922_v46 = vrot.slane %v860_v24, 6 }
 0x400   :  { %v876_v6 = vsub.f32 1.0, %v1524_v4  ;;  %v929_v47 = vrot.slane %v1524_v4, 6  ;;  %v1672_v4 = vld [vmem:[#allocation6 + $0x10] sm:$0xff] }
 0x401   :  { %1159 = vmatpush.bf16.msrb.mxu2 %v1672_v4 }
 0x402   :  { %v877_v7 = vmul.f32 %v876_v6, %v875_v5  ;;  %v946_v53 = vsel %vm401_vm9, %v1523_v62, %v929_v47  ;;  %v1665_v62 = vld [vmem:[%s2063_s8 + $0x8] sm:$0xff]  ;;  %v1670_v6 = vld [vmem:[#allocation6] sm:$0xff] }
 0x403   :  { %v1671_v5 = vld [vmem:[#allocation6 + $0x8] sm:$0xff] }
 0x404   :  { %v880_v9 = vadd.f32 %v878_v8, %v877_v7  ;;  %v1677_v7 = vld [vmem:[#allocation6 + $0x38] sm:$0xff]  ;;  %v1676_v8 = vld [vmem:[#allocation6 + $0x30] sm:$0xff] }
 0x405   :  { %1160 = vmatpush.bf16.msrb.mxu2 %v1671_v5  ;;  %1109 = vmatpush.bf16.msrb.mxu1 %v1677_v7 }
 0x406   :  { %vm881_vm7 = vcmp.ge.f32.partialorder %v880_v9, 1.0  ;;  %v884_v11 = vmul.f32 0.9, %v880_v9 }
 0x407   :  { %v1525_v10 = vsel %vm881_vm7, 1.0, %v1779_v33 }
 0x408   :  { %v885_v12 = vsub.f32 1.0, %v1525_v10  ;;  %v932_v48 = vrot.slane %v1525_v10, 4  ;;  %v1675_v10 = vld [vmem:[#allocation6 + $0x28] sm:$0xff] }
 0x409   :  { %1161 = vmatpush.bf16.msrb.mxu2 %v1670_v6  ;;  %1110 = vmatpush.bf16.msrb.mxu1 %v1676_v8 }
 0x40a   :  { %v886_v15 = vmul.f32 %v885_v12, %v884_v11  ;;  %v947_v55 = vsel %vm403_vm11, %v946_v53, %v932_v48  ;;  %v1674_v11 = vld [vmem:[#allocation6 + $0x20] sm:$0xff] }
 0x40c   :  { %v889_v19 = vadd.f32 %v887_v14, %v886_v15  ;;  %v1681_v15 = vld [vmem:[#allocation6 + $0x58] sm:$0xff] }
 0x40d   :  { %1111 = vmatpush.bf16.msrb.mxu1 %v1675_v10  ;;  %1218 = vmatpush.bf16.msrb.mxu3 %v1681_v15 }
 0x40e   :  { %vm890_vm8 = vcmp.ge.f32.partialorder %v889_v19, 1.0  ;;  %v893_v22 = vmul.f32 0.9, %v889_v19 }
 0x40f   :  { %v1526_v21 = vsel %vm890_vm8, 1.0, %v1779_v33 }
 0x410   :  { %v894_v23 = vsub.f32 1.0, %v1526_v21  ;;  %v935_v51 = vrot.slane %v1526_v21, 2  ;;  %v1678_v21 = vld [vmem:[#allocation6 + $0x40] sm:$0xff] }
 0x411   :  { %1112 = vmatpush.bf16.msrb.mxu1 %v1674_v11  ;;  %1219 = vmatpush.bf16.msrb.mxu3 %v1680_v18 }
 0x412   :  { %v895_v25 = vmul.f32 %v894_v23, %v893_v22  ;;  %v948_v57 = vsel %vm405_vm12, %v947_v55, %v935_v51  ;;  %v1697_v51 = vld [vmem:[%s2064_s9 + $0x3] ss:$0 sm:$0xff] }
 0x413   :  { %v952_v61 = vadd.f32 %v948_v57, %v1930_v32  ;;  %v1666_v32 = vld [vmem:[%s2063_s8 + $0x10] sm:$0xff] }
 0x414   :  { %v896_v26 = vadd.f32 %v895_v25, %v860_v24 }
 0x415   :  { %1220 = vmatpush.bf16.msrb.mxu3 %v1679_v20 }
 0x416   :  { %vm897_vm10 = vcmp.ge.f32.partialorder %v896_v26, 1.0  ;;  %v900_v28 = vmul.f32 0.9, %v896_v26 }
 0x417   :  { %v1527_v27 = vsel %vm897_vm10, 1.0, %v1779_v33 }
 0x418   :  { %v901_v29 = vsub.f32 1.0, %v1527_v27 }
 0x419   :  { %1221 = vmatpush.bf16.msrb.mxu3 %v1678_v21 }
 0x41a   :  { %v902_v30 = vmul.f32 %v901_v29, %v900_v28 }
 0x41c   :  { %v906_v36 = vadd.f32 %v904_v31, %v902_v30 }
 0x41e   :  { %vm907_vm14 = vcmp.ge.f32.partialorder %v906_v36, 1.0  ;;  %v910_v37 = vmul.f32 0.9, %v906_v36 }
 0x41f   :  { %v1528_v34 = vsel %vm907_vm14, 1.0, %v1779_v33 }
 0x420   :  { %v911_v38 = vsub.f32 1.0, %v1528_v34  ;;  %v938_v50 = vrot.slane %v1528_v34, 6 }
 0x422   :  { %v912_v39 = vmul.f32 %v911_v38, %v910_v37  ;;  %v949_v58 = vsel %vm401_vm9, %v1527_v27, %v938_v50 }
 0x424   :  { %v915_v41 = vadd.f32 %v913_v40, %v912_v39 }
 0x426   :  { %vm916_vm15 = vcmp.ge.f32.partialorder %v915_v41, 1.0  ;;  %v919_v43 = vmul.f32 0.9, %v915_v41 }
 0x427   :  { %v1529_v42 = vsel %vm916_vm15, 1.0, %v1779_v33 }
 0x428   :  { %v920_v44 = vsub.f32 1.0, %v1529_v42  ;;  %v941_v52 = vrot.slane %v1529_v42, 4 }
 0x42a   :  { %v921_v45 = vmul.f32 %v920_v44, %v919_v43  ;;  %v950_v59 = vsel %vm403_vm11, %v949_v58, %v941_v52 }
 0x42c   :  { %v924_v49 = vadd.f32 %v922_v46, %v921_v45 }
 0x42e   :  { %vm925_vm2 = vcmp.ge.f32.partialorder %v924_v49, 1.0 }
 0x42f   :  { %v1530_v54 = vsel %vm925_vm2, 1.0, %v1779_v33  ;;  %v1664_v33 = vld [vmem:[%s2063_s8] sm:$0xff] }
 0x430   :  { %v944_v56 = vrot.slane %v1530_v54, 2 }
 0x432   :  { %v951_v60 = vsel %vm405_vm12, %v950_v59, %v944_v56 }
 0x433   :  { %v953_v63 = vadd.f32 %v951_v60, %v1933_v35  ;;  %v1667_v35 = vld [vmem:[%s2063_s8 + $0x18] sm:$0xff] }
 0x435   :  { %v954_v0 = vpack.c.bf16 %v953_v63, %v952_v61  ;;  %v1243_v61 = vld [vmem:[%s2065_s10] sm:$0xff]  ;;  %v1246_v63 = vld [vmem:[%s2065_s10 + $0x18] sm:$0xff] }
 0x437   :  { %1022 = vmatpush.bf16.msra.mxu0 %v954_v0  ;;  %v1244_v0 = vld [vmem:[%s2065_s10 + $0x8] sm:$0xff] }
 0x43a   :  { %1555 = vmatmul.msk.bf16.vlgmr.msra.gmra.mxu0 %vm422_vm13, %v1664_v33  ;;  %v1245_v33 = vld [vmem:[%s2065_s10 + $0x10] sm:$0xff] }
 0x44a   :  { %1556 = vmatmul.msk.bf16.gmra.mxu0 %vm422_vm13, %v1665_v62 }
 0x45a   :  { %1557 = vmatmul.msk.bf16.gmra.mxu0 %vm422_vm13, %v1666_v32 }
 0x46a   :  { %1558 = vmatmul.msk.bf16.gmra.mxu0 %vm422_vm13, %v1667_v35 }
 0x47a   :  { %1559 = vmatmul.msk.bf16.gmra.mxu0 %vm422_vm13, %v1668_v2 }
 0x48a   :  { %1560 = vmatmul.msk.bf16.gmra.mxu0 %vm422_vm13, %v1669_v3 }
 0x4b7   :  { %v1024_v9 = vpop.f32.mrf.mxu0 }
 0x4bf   :  { %v1026_v12 = vpop.f32.mrf.mxu0 }
 0x4c0   :  { %v1054_v13 = vpack.c.bf16 %v1026_v12, %v1024_v9 }
 0x4c2   :  { %1595 = vmatmul.msk.bf16.vlgmr.msrb.gmra.mxu2 %vm200_vm1, %v1054_v13 }
 0x4c7   :  { %v1029_v14 = vpop.f32.mrf.mxu0 }
 0x4cf   :  { %v1031_v16 = vpop.f32.mrf.mxu0 }
 0x4d0   :  { %v1055_v17 = vpack.c.bf16 %v1031_v16, %v1029_v14 }
 0x4d2   :  { %1596 = vmatmul.msk.bf16.gmra.mxu2 %vm200_vm1, %v1055_v17 }
 0x4d7   :  { %v1034_v19 = vpop.f32.mrf.mxu0 }
 0x4df   :  { %v1036_v22 = vpop.f32.mrf.mxu0 }
 0x4e0   :  { %v1064_v23 = vpack.c.bf16 %v1036_v22, %v1034_v19 }
 0x4e2   :  { %1577 = vmatmul.msk.bf16.vlgmr.msrb.gmra.mxu1 %vm200_vm1, %v1064_v23 }
 0x4e7   :  { %v1039_v24 = vpop.f32.mrf.mxu0 }
 0x4ef   :  { %v1041_v25 = vpop.f32.mrf.mxu0 }
 0x4f0   :  { %v1065_v26 = vpack.c.bf16 %v1041_v25, %v1039_v24 }
 0x4f2   :  { %1578 = vmatmul.msk.bf16.gmra.mxu1 %vm200_vm1, %v1065_v26 }
 0x4f7   :  { %v1044_v27 = vpop.f32.mrf.mxu0 }
 0x4ff   :  { %v1046_v28 = vpop.f32.mrf.mxu0 }
 0x500   :  { %v1173_v29 = vpack.c.bf16 %v1046_v28, %v1044_v27 }
 0x502   :  { %1613 = vmatmul.msk.bf16.vlgmr.msrb.gmra.mxu3 %vm200_vm1, %v1173_v29 }
 0x507   :  { %v1049_v30 = vpop.f32.mrf.mxu0 }
 0x50f   :  { %v1051_v31 = vpop.f32.mrf.mxu0 }
 0x510   :  { %v1174_v36 = vpack.c.bf16 %v1051_v31, %v1049_v30 }
 0x512   :  { %1614 = vmatmul.msk.bf16.gmra.mxu3 %vm200_vm1, %v1174_v36 }
 0x545   :  { %v1163_v37 = vpop.f32.mrf.mxu2 }
 0x54d   :  { %v1165_v40 = vpop.f32.mrf.mxu2 }
 0x555   :  { %v1168_v43 = vpop.f32.mrf.mxu2 }
 0x55d   :  { %v1170_v46 = vpop.f32.mrf.mxu2 }
 0x55f   :  { %v1114_v34 = vpop.f32.mrf.mxu1 }
 0x560   :  { %v1164_v54 = vadd.f32 %v1163_v37, %v1114_v34 }
 0x567   :  { %v1116_v38 = vpop.f32.mrf.mxu1 }
 0x568   :  { %v1166_v50 = vadd.f32 %v1165_v40, %v1116_v38 }
 0x56f   :  { %v1119_v42 = vpop.f32.mrf.mxu1 }
 0x570   :  { %v1169_v47 = vadd.f32 %v1168_v43, %v1119_v42 }
 0x577   :  { %v1121_v45 = vpop.f32.mrf.mxu1 }
 0x578   :  { %v1171_v48 = vadd.f32 %v1170_v46, %v1121_v45 }
 0x585   :  { %v1223_v39 = vpop.f32.mrf.mxu3 }
 0x586   :  { %v1233_v57 = vadd.f32 %v1223_v39, %v1164_v54 }
 0x588   :  { %v1239_v60 = vadd.f32 %v1697_v51, %v1233_v57 }
 0x58d   :  { %v1225_v41 = vpop.f32.mrf.mxu3 }
 0x58e   :  { %v1234_v55 = vadd.f32 %v1225_v41, %v1166_v50 }
 0x590   :  { %v1240_v59 = vadd.f32 %v1697_v51, %v1234_v55 }
 0x595   :  { %v1228_v44 = vpop.f32.mrf.mxu3 }
 0x596   :  { %v1235_v52 = vadd.f32 %v1228_v44, %v1169_v47 }
 0x598   :  { %v1241_v58 = vadd.f32 %v1697_v51, %v1235_v52 }
 0x59d   :  { %v1230_v49 = vpop.f32.mrf.mxu3 }
 0x59e   :  { %v1236_v53 = vadd.f32 %v1230_v49, %v1171_v48 }
 0x5a0   :  { %v1242_v56 = vadd.f32 %v1697_v51, %v1236_v53 }
 0x5a2   :  { %1271 = vmatpush.msra.mxu1 %v1242_v56  ;;  %1684 = vmatpush.msra.mxu3 %v1242_v56 }
 0x5a4   :  { %1272 = vmatpush.msra.mxu1 %v1241_v58  ;;  %1685 = vmatpush.msra.mxu3 %v1241_v58 }
 0x5a6   :  { %1273 = vmatpush.msra.mxu1 %v1240_v59  ;;  %1686 = vmatpush.msra.mxu3 %v1240_v59 }
 0x5a8   :  { %1274 = vmatpush.msra.mxu1 %v1239_v60  ;;  %1687 = vmatpush.msra.mxu3 %v1239_v60 }
 0x5a9   :  { %1615 = vmatmul.msk.f32.vlgmr.msra.gmra.mxu1 %vm123_vm0, %v1243_v61  ;;  %1618 = vmatmul.msk.f32.vlgmr.msra.gmra.mxu3 %vm123_vm0, %v1246_v63 }
 0x5b1   :  { %1616 = vmatmul.msk.f32.gmra.mxu1 %vm123_vm0, %v1244_v0 }
 0x5b9   :  { %1617 = vmatmul.msk.f32.gmra.mxu1 %vm123_vm0, %v1245_v33 }
 0x626   :  { %v1276_v62 = vpop.f32.mrf.mxu1 }
 0x627   :  { %1288 = vst.msk [vmem:[%s2066_s11] sm:$0xff] %vm200_vm1, %v1276_v62 }
 0x62c   :  { %v1285_v32 = vpop.f32.mrf.mxu3 }
 0x62d   :  { %1291 = vst.msk [vmem:[%s2066_s11 + $0x18] sm:$0xff] %vm200_vm1, %v1285_v32 }
 0x62e   :  { %v1279_v35 = vpop.f32.mrf.mxu1 }
 0x62f   :  { %1289 = vst.msk [vmem:[%s2066_s11 + $0x8] sm:$0xff] %vm200_vm1, %v1279_v35 }
 0x636   :  { %v1282_v1 = vpop.f32.mrf.mxu1 }
 0x637   :  { %1290 = vst.msk [vmem:[%s2066_s11 + $0x10] sm:$0xff] %vm200_vm1, %v1282_v1 }
 0x638   :  { %1296 = vsyncpa [#allocation3], 1 }
 0x639   :  { %1297 = vsyncpa [#allocation5], 1 }

</bundles_post_ra>
